<compile_context>
chip_gen: v7x
topology: tpu7x:2x2x1
jax: 0.10.0
libtpu: 0.0.40
codegen_flags: <defaults>
</compile_context>

<pallas_src>
import functools

import jax
import jax.numpy as jnp
from jax import lax
from jax.experimental import pallas as pl
from jax.experimental.pallas import tpu as pltpu

EPS = 1e-5  # PyTorch nn.LayerNorm default eps


def _layernorm(x, gamma, beta):
    mu = jnp.mean(x, axis=-1, keepdims=True)
    var = jnp.mean(jnp.square(x - mu), axis=-1, keepdims=True)
    return (x - mu) * lax.rsqrt(var + EPS) * gamma + beta


# --------------------------- fused Pallas kernel -----------------------------

def vit_kernel(patches_ref, pe_ref, ew_ref, eb_ref,
               ln1g_ref, ln1b_ref, wq_ref, wk_ref, wv_ref, wo_ref,
               ln2g_ref, ln2b_ref, w1_ref, b1_ref, w2_ref, b2_ref,
               hg_ref, hb_ref, hw_ref, hbias_ref,
               o_ref, x_sc, *, scale):
    """One batch element per batch-grid step; one transformer layer per depth step."""
    l = pl.program_id(1)
    depth = pl.num_programs(1)
    N, D = x_sc.shape
    heads = wq_ref.shape[1]

    # ---- patch embedding + positional embedding (first depth step only) ----
    @pl.when(l == 0)
    def _():
        p = patches_ref[0].astype(jnp.bfloat16)                       # (N, patch_dim)
        x0 = jnp.dot(p, ew_ref[...],
                     preferred_element_type=jnp.float32) + eb_ref[...]
        x_sc[...] = x0 + pe_ref[...]

    x = x_sc[...]                                                     # (N, D) f32 residual

    # -------------------------- attention block -----------------------------
    xn = _layernorm(x, ln1g_ref[0], ln1b_ref[0]).astype(jnp.bfloat16)
    xn_h = jnp.broadcast_to(xn, (heads, N, D))                        # head-batched lhs

    # weights are (heads, dim_head, dim): q_h = xn @ Wq_h^T  (PyTorch Linear layout)
    q = jnp.einsum('hnd,hkd->hnk', xn_h, wq_ref[0],
                   preferred_element_type=jnp.float32) * scale        # (h, N, dh)
    k = jnp.einsum('hnd,hkd->hnk', xn_h, wk_ref[0],
                   preferred_element_type=jnp.float32)
    v = jnp.einsum('hnd,hkd->hnk', xn_h, wv_ref[0],
                   preferred_element_type=jnp.float32)

    dots = jnp.einsum('hqd,hkd->hqk', q.astype(jnp.bfloat16),
                      k.astype(jnp.bfloat16),
                      preferred_element_type=jnp.float32)             # (h, N, N)
    dots = dots - jnp.max(dots, axis=-1, keepdims=True)
    e = jnp.exp(dots)
    attn = e * pl.reciprocal(jnp.sum(e, axis=-1, keepdims=True), approx=True)

    ctx = jnp.einsum('hqk,hkd->hqd', attn.astype(jnp.bfloat16),
                     v.astype(jnp.bfloat16),
                     preferred_element_type=jnp.float32)              # (h, N, dh)
    # per-head output projection, summed over heads == Linear(inner, dim) on the concat
    proj = jnp.einsum('hnd,hde->hne', ctx.astype(jnp.bfloat16), wo_ref[0],
                      preferred_element_type=jnp.float32)             # (h, N, D)
    x = x + jnp.sum(proj, axis=0)

    # -------------------------- feed-forward block ---------------------------
    xn2 = _layernorm(x, ln2g_ref[0], ln2b_ref[0]).astype(jnp.bfloat16)
    hdn = jnp.dot(xn2, w1_ref[0],
                  preferred_element_type=jnp.float32) + b1_ref[0]
    hdn = 0.5 * hdn * (1.0 + lax.erf(hdn * jnp.float32(0.7071067811865475)))  # exact GELU
    x = x + jnp.dot(hdn.astype(jnp.bfloat16), w2_ref[0],
                    preferred_element_type=jnp.float32) + b2_ref[0]

    x_sc[...] = x                                                     # carry to next layer

    # ---- classifier head (last depth step only) ----
    @pl.when(l == depth - 1)
    def _():
        m = jnp.mean(x, axis=0, keepdims=True)                        # (1, D) token mean
        mn = _layernorm(m, hg_ref[...], hb_ref[...]).astype(jnp.bfloat16)
        o_ref[0] = jnp.dot(mn, hw_ref[...],
                           preferred_element_type=jnp.float32) + hbias_ref[...]


# --------------------------- pallas_call wrapper ------------------------------

def _const_spec(arr):
    nd = arr.ndim
    return pl.BlockSpec(arr.shape, lambda b, l, _nd=nd: (0,) * _nd)


def _layer_spec(arr):
    nd = arr.ndim
    return pl.BlockSpec((1,) + arr.shape[1:],
                        lambda b, l, _nd=nd: (l,) + (0,) * (_nd - 1))


def posemb_sincos_2d(h, w, dim, temperature=10000.0, dtype=jnp.float32):
    assert dim % 4 == 0, 'feature dimension must be multiple of 4 for sincos emb'
    y, x = jnp.meshgrid(jnp.arange(h), jnp.arange(w), indexing='ij')
    omega = jnp.arange(dim // 4) / (dim // 4 - 1)
    omega = 1.0 / (temperature ** omega)
    y = y.flatten()[:, None] * omega[None, :]
    x = x.flatten()[:, None] * omega[None, :]
    pe = jnp.concatenate([jnp.sin(x), jnp.cos(x), jnp.sin(y), jnp.cos(y)], axis=1)
    return pe.astype(dtype)


def simple_vit_forward(img, params, *, patch_size):
    B, C, H, W = img.shape
    ph = pw = patch_size
    h, w = H // ph, W // pw
    N = h * w
    patch_dim = C * ph * pw
    # 'b c (h p1) (w p2) -> b (h w) (p1 p2 c)'   (layout glue, plain JAX)
    patches = (img.reshape(B, C, h, ph, w, pw)
                  .transpose(0, 2, 4, 3, 5, 1)
                  .reshape(B, N, patch_dim))

    dim = params['embed_w'].shape[1]
    depth = params['wq'].shape[0]
    dim_head = params['wq'].shape[2]
    num_classes = params['head_w'].shape[1]
    scale = float(dim_head) ** -0.5

    pe = posemb_sincos_2d(h, w, dim)

    in_specs = [
        pl.BlockSpec((1, N, patch_dim), lambda b, l: (b, 0, 0)),
        _const_spec(pe), _const_spec(params['embed_w']), _const_spec(params['embed_b']),
        _layer_spec(params['ln1_g']), _layer_spec(params['ln1_b']),
        _layer_spec(params['wq']), _layer_spec(params['wk']),
        _layer_spec(params['wv']), _layer_spec(params['wo']),
        _layer_spec(params['ln2_g']), _layer_spec(params['ln2_b']),
        _layer_spec(params['w1']), _layer_spec(params['b1']),
        _layer_spec(params['w2']), _layer_spec(params['b2']),
        _const_spec(params['head_g']), _const_spec(params['head_b']),
        _const_spec(params['head_w']), _const_spec(params['head_bias']),
    ]

    out = pl.pallas_call(
        functools.partial(vit_kernel, scale=scale),
        out_shape=jax.ShapeDtypeStruct((B, 1, num_classes), jnp.float32),
        grid_spec=pltpu.PrefetchScalarGridSpec(
            num_scalar_prefetch=0,
            grid=(B, depth),                       # batch outer (parallel), depth inner
            in_specs=in_specs,
            out_specs=pl.BlockSpec((1, 1, num_classes), lambda b, l: (b, 0, 0)),
            scratch_shapes=[pltpu.VMEM((N, dim), jnp.float32)],   # resident residual stream
        ),
        # TODO(synk): for ViT-B-class shapes raise vmem_limit_bytes and/or K-tile the MLP.
        compiler_params=pltpu.CompilerParams(
            dimension_semantics=("parallel", "arbitrary")),
    )(patches, pe, params['embed_w'], params['embed_b'],
      params['ln1_g'], params['ln1_b'],
      params['wq'], params['wk'], params['wv'], params['wo'],
      params['ln2_g'], params['ln2_b'],
      params['w1'], params['b1'], params['w2'], params['b2'],
      params['head_g'], params['head_b'], params['head_w'], params['head_bias'])
    return out[:, 0, :]


# --------------------------- params ------------------------------------------

def init_params(key, *, patch_dim, dim, depth, heads, dim_head, mlp_dim, num_classes):
    keys = jax.random.split(key, 8)

    def wbf16(k, shape, fan_in):
        return (jax.random.normal(k, shape, jnp.float32) /
                jnp.sqrt(jnp.float32(fan_in))).astype(jnp.bfloat16)

    return {
        'embed_w': wbf16(keys[0], (patch_dim, dim), patch_dim),
        'embed_b': jnp.zeros((1, dim), jnp.float32),
        'ln1_g': jnp.ones((depth, 1, dim), jnp.float32),
        'ln1_b': jnp.zeros((depth, 1, dim), jnp.float32),
        # head-major projections (depth, heads, dim_head, dim): q_h = x @ Wq_h^T
        'wq': wbf16(keys[1], (depth, heads, dim_head, dim), dim),
        'wk': wbf16(keys[2], (depth, heads, dim_head, dim), dim),
        'wv': wbf16(keys[3], (depth, heads, dim_head, dim), dim),
        # head-major output projection; summing heads == Linear(heads*dim_head, dim)
        'wo': wbf16(keys[4], (depth, heads, dim_head, dim), heads * dim_head),
        'ln2_g': jnp.ones((depth, 1, dim), jnp.float32),
        'ln2_b': jnp.zeros((depth, 1, dim), jnp.float32),
        'w1': wbf16(keys[5], (depth, dim, mlp_dim), dim),
        'b1': jnp.zeros((depth, 1, mlp_dim), jnp.float32),
        'w2': wbf16(keys[6], (depth, mlp_dim, dim), mlp_dim),
        'b2': jnp.zeros((depth, 1, dim), jnp.float32),
        'head_g': jnp.ones((1, dim), jnp.float32),
        'head_b': jnp.zeros((1, dim), jnp.float32),
        'head_w': wbf16(keys[7], (dim, num_classes), dim),
        'head_bias': jnp.zeros((1, num_classes), jnp.float32),
    }


# --------------------------- main --------------------------------------------

if __name__ == "__main__":
    key = jax.random.PRNGKey(0)
    kimg, kparam = jax.random.split(key)

    # small SimpleViT config (lane-dense dim=128, inner=heads*dim_head=128)
    B, C, H, W = 2, 3, 16, 16
    patch_size = 4
    dim, depth, heads, dim_head, mlp_dim, num_classes = 128, 2, 4, 32, 256, 10
    patch_dim = C * patch_size * patch_size  # 48

    img = jax.random.normal(kimg, (B, C, H, W), jnp.float32)
    params = init_params(kparam, patch_dim=patch_dim, dim=dim, depth=depth,
                         heads=heads, dim_head=dim_head, mlp_dim=mlp_dim,
                         num_classes=num_classes)

    logits = simple_vit_forward(img, params, patch_size=patch_size)
    logits = jax.block_until_ready(logits)
    assert logits.shape == (B, num_classes)
    assert bool(jnp.all(jnp.isfinite(logits)))
    print("KERNEL_OK")
</pallas_src>

<mosaic_0001>
module attributes {stable_mosaic.version = 11 : i64} {
  func.func @vit_kernel(%arg0: i32, %arg1: i32, %arg2: memref<1x16x48xf32, #tpu.memory_space<vmem>>, %arg3: memref<16x128xf32, #tpu.memory_space<vmem>>, %arg4: memref<48x128xbf16, #tpu.memory_space<vmem>>, %arg5: memref<1x128xf32, #tpu.memory_space<vmem>>, %arg6: memref<1x1x128xf32, #tpu.memory_space<vmem>>, %arg7: memref<1x1x128xf32, #tpu.memory_space<vmem>>, %arg8: memref<1x4x32x128xbf16, #tpu.memory_space<vmem>>, %arg9: memref<1x4x32x128xbf16, #tpu.memory_space<vmem>>, %arg10: memref<1x4x32x128xbf16, #tpu.memory_space<vmem>>, %arg11: memref<1x4x32x128xbf16, #tpu.memory_space<vmem>>, %arg12: memref<1x1x128xf32, #tpu.memory_space<vmem>>, %arg13: memref<1x1x128xf32, #tpu.memory_space<vmem>>, %arg14: memref<1x128x256xbf16, #tpu.memory_space<vmem>>, %arg15: memref<1x1x256xf32, #tpu.memory_space<vmem>>, %arg16: memref<1x256x128xbf16, #tpu.memory_space<vmem>>, %arg17: memref<1x1x128xf32, #tpu.memory_space<vmem>>, %arg18: memref<1x128xf32, #tpu.memory_space<vmem>>, %arg19: memref<1x128xf32, #tpu.memory_space<vmem>>, %arg20: memref<128x10xbf16, #tpu.memory_space<vmem>>, %arg21: memref<1x10xf32, #tpu.memory_space<vmem>>, %arg22: memref<1x1x10xf32, #tpu.memory_space<vmem>>, %arg23: memref<16x128xf32, #tpu.memory_space<vmem>>) attributes {dimension_semantics = [#tpu.dimension_semantics<parallel>, #tpu.dimension_semantics<arbitrary>], iteration_bounds = array<i64: 2, 2>, scalar_prefetch = 0 : i64, scratch_operands = 1 : i64, tpu.core_type = #tpu.core_type<tc>, window_params = [{transform_indices = @transform_0, window_bounds = array<i64: 1, 16, 48>}, {pipeline_mode = #tpu.pipeline_mode<synchronous>, transform_indices = @transform_1, window_bounds = array<i64: 16, 128>}, {pipeline_mode = #tpu.pipeline_mode<synchronous>, transform_indices = @transform_2, window_bounds = array<i64: 48, 128>}, {pipeline_mode = #tpu.pipeline_mode<synchronous>, transform_indices = @transform_3, window_bounds = array<i64: 1, 128>}, {transform_indices = @transform_4, window_bounds = array<i64: 1, 1, 128>}, {transform_indices = @transform_5, window_bounds = array<i64: 1, 1, 128>}, {transform_indices = @transform_6, window_bounds = array<i64: 1, 4, 32, 128>}, {transform_indices = @transform_7, window_bounds = array<i64: 1, 4, 32, 128>}, {transform_indices = @transform_8, window_bounds = array<i64: 1, 4, 32, 128>}, {transform_indices = @transform_9, window_bounds = array<i64: 1, 4, 32, 128>}, {transform_indices = @transform_10, window_bounds = array<i64: 1, 1, 128>}, {transform_indices = @transform_11, window_bounds = array<i64: 1, 1, 128>}, {transform_indices = @transform_12, window_bounds = array<i64: 1, 128, 256>}, {transform_indices = @transform_13, window_bounds = array<i64: 1, 1, 256>}, {transform_indices = @transform_14, window_bounds = array<i64: 1, 256, 128>}, {transform_indices = @transform_15, window_bounds = array<i64: 1, 1, 128>}, {pipeline_mode = #tpu.pipeline_mode<synchronous>, transform_indices = @transform_16, window_bounds = array<i64: 1, 128>}, {pipeline_mode = #tpu.pipeline_mode<synchronous>, transform_indices = @transform_17, window_bounds = array<i64: 1, 128>}, {pipeline_mode = #tpu.pipeline_mode<synchronous>, transform_indices = @transform_18, window_bounds = array<i64: 128, 10>}, {pipeline_mode = #tpu.pipeline_mode<synchronous>, transform_indices = @transform_19, window_bounds = array<i64: 1, 10>}, {transform_indices = @transform_20, window_bounds = array<i64: 1, 1, 10>}]} {
    %c0_i32 = arith.constant 0 : i32
    %0 = arith.cmpi eq, %arg1, %c0_i32 : i32
    %1 = arith.extui %0 : i1 to i32
    %c0_i32_0 = arith.constant 0 : i32
    %2 = arith.cmpi ne, %1, %c0_i32_0 : i32
    scf.if %2 {
      %c0_69 = arith.constant 0 : index
      %c0_70 = arith.constant 0 : index
      %c0_71 = arith.constant 0 : index
      %121 = vector.load %arg2[%c0_69, %c0_70, %c0_71] : memref<1x16x48xf32, #tpu.memory_space<vmem>>, vector<1x16x48xf32>
      %122 = vector.shape_cast %121 : vector<1x16x48xf32> to vector<16x48xf32>
      %123 = arith.truncf %122 : vector<16x48xf32> to vector<16x48xbf16>
      %c0_72 = arith.constant 0 : index
      %c0_73 = arith.constant 0 : index
      %124 = vector.load %arg4[%c0_72, %c0_73] : memref<48x128xbf16, #tpu.memory_space<vmem>>, vector<48x128xbf16>
      %cst_74 = arith.constant dense<0.000000e+00> : vector<16x128xf32>
      %125 = tpu.matmul %123, %124, %cst_74 {dimension_numbers = #tpu.dot_dimension_numbers<[1], [0], [0], [1], [0, 0, 1, 1], [], []>} : vector<16x48xbf16>, vector<48x128xbf16>, vector<16x128xf32> -> vector<16x128xf32>
      %c0_75 = arith.constant 0 : index
      %c0_76 = arith.constant 0 : index
      %126 = vector.load %arg5[%c0_75, %c0_76] : memref<1x128xf32, #tpu.memory_space<vmem>>, vector<1x128xf32>
      %127 = vector.broadcast %126 : vector<1x128xf32> to vector<16x128xf32>
      %128 = arith.addf %125, %127 : vector<16x128xf32>
      %c0_77 = arith.constant 0 : index
      %c0_78 = arith.constant 0 : index
      %129 = vector.load %arg3[%c0_77, %c0_78] : memref<16x128xf32, #tpu.memory_space<vmem>>, vector<16x128xf32>
      %130 = arith.addf %128, %129 : vector<16x128xf32>
      %c0_79 = arith.constant 0 : index
      %c0_80 = arith.constant 0 : index
      %131 = vector.load %arg23[%c0_79, %c0_80] : memref<16x128xf32, #tpu.memory_space<vmem>>, vector<16x128xf32>
      tpu.vector_store %arg23[%c0_79, %c0_80], %130 {strides = array<i32>} : memref<16x128xf32, #tpu.memory_space<vmem>>, vector<16x128xf32>,
    } else {
    }
    %c0 = arith.constant 0 : index
    %c0_1 = arith.constant 0 : index
    %3 = vector.load %arg23[%c0, %c0_1] : memref<16x128xf32, #tpu.memory_space<vmem>>, vector<16x128xf32>
    %c0_2 = arith.constant 0 : index
    %c0_3 = arith.constant 0 : index
    %c0_4 = arith.constant 0 : index
    %4 = vector.load %arg6[%c0_2, %c0_3, %c0_4] : memref<1x1x128xf32, #tpu.memory_space<vmem>>, vector<1x1x128xf32>
    %5 = vector.shape_cast %4 : vector<1x1x128xf32> to vector<1x128xf32>
    %c0_5 = arith.constant 0 : index
    %c0_6 = arith.constant 0 : index
    %c0_7 = arith.constant 0 : index
    %6 = vector.load %arg7[%c0_5, %c0_6, %c0_7] : memref<1x1x128xf32, #tpu.memory_space<vmem>>, vector<1x1x128xf32>
    %7 = vector.shape_cast %6 : vector<1x1x128xf32> to vector<1x128xf32>
    %cst = arith.constant dense<0.000000e+00> : vector<16xf32>
    %8 = vector.multi_reduction <add>, %3, %cst [1] : vector<16x128xf32> to vector<16xf32>
    %9 = vector.shape_cast %8 : vector<16xf32> to vector<16x1xf32>
    %cst_8 = arith.constant 1.280000e+02 : f32
    %10 = vector.broadcast %cst_8 : f32 to vector<16x1xf32>
    %11 = arith.divf %9, %10 : vector<16x1xf32>
    %12 = vector.broadcast %11 : vector<16x1xf32> to vector<16x128xf32>
    %13 = arith.subf %3, %12 : vector<16x128xf32>
    %14 = arith.mulf %13, %13 : vector<16x128xf32>
    %cst_9 = arith.constant dense<0.000000e+00> : vector<16xf32>
    %15 = vector.multi_reduction <add>, %14, %cst_9 [1] : vector<16x128xf32> to vector<16xf32>
    %16 = vector.shape_cast %15 : vector<16xf32> to vector<16x1xf32>
    %cst_10 = arith.constant 1.280000e+02 : f32
    %17 = vector.broadcast %cst_10 : f32 to vector<16x1xf32>
    %18 = arith.divf %16, %17 : vector<16x1xf32>
    %19 = vector.broadcast %11 : vector<16x1xf32> to vector<16x128xf32>
    %20 = arith.subf %3, %19 : vector<16x128xf32>
    %cst_11 = arith.constant 9.99999974E-6 : f32
    %21 = vector.broadcast %cst_11 : f32 to vector<16x1xf32>
    %22 = arith.addf %18, %21 : vector<16x1xf32>
    %23 = math.rsqrt %22 : vector<16x1xf32>
    %24 = vector.broadcast %23 : vector<16x1xf32> to vector<16x128xf32>
    %25 = arith.mulf %20, %24 : vector<16x128xf32>
    %26 = vector.broadcast %5 : vector<1x128xf32> to vector<16x128xf32>
    %27 = arith.mulf %25, %26 : vector<16x128xf32>
    %28 = vector.broadcast %7 : vector<1x128xf32> to vector<16x128xf32>
    %29 = arith.addf %27, %28 : vector<16x128xf32>
    %30 = arith.truncf %29 : vector<16x128xf32> to vector<16x128xbf16>
    %31 = vector.shape_cast %30 : vector<16x128xbf16> to vector<1x16x128xbf16>
    %32 = vector.broadcast %31 : vector<1x16x128xbf16> to vector<4x16x128xbf16>
    %c0_12 = arith.constant 0 : index
    %c0_13 = arith.constant 0 : index
    %c0_14 = arith.constant 0 : index
    %c0_15 = arith.constant 0 : index
    %33 = vector.load %arg8[%c0_12, %c0_13, %c0_14, %c0_15] : memref<1x4x32x128xbf16, #tpu.memory_space<vmem>>, vector<1x4x32x128xbf16>
    %34 = vector.shape_cast %33 : vector<1x4x32x128xbf16> to vector<4x32x128xbf16>
    "tpu.trace_start"() <{level = 10 : i32, message = "hnd,hkd->hnk"}> : () -> ()
    %cst_16 = arith.constant dense<0.000000e+00> : vector<4x16x32xf32>
    %35 = tpu.matmul %32, %34, %cst_16 {dimension_numbers = #tpu.dot_dimension_numbers<[2], [2], [1], [1], [0, 0, 0, 1, 1, 1], [0], [0]>} : vector<4x16x128xbf16>, vector<4x32x128xbf16>, vector<4x16x32xf32> -> vector<4x16x32xf32>
    "tpu.trace_stop"() : () -> ()
    %cst_17 = arith.constant 0.176776692 : f32
    %36 = vector.broadcast %cst_17 : f32 to vector<4x16x32xf32>
    %37 = arith.mulf %35, %36 : vector<4x16x32xf32>
    %c0_18 = arith.constant 0 : index
    %c0_19 = arith.constant 0 : index
    %c0_20 = arith.constant 0 : index
    %c0_21 = arith.constant 0 : index
    %38 = vector.load %arg9[%c0_18, %c0_19, %c0_20, %c0_21] : memref<1x4x32x128xbf16, #tpu.memory_space<vmem>>, vector<1x4x32x128xbf16>
    %39 = vector.shape_cast %38 : vector<1x4x32x128xbf16> to vector<4x32x128xbf16>
    "tpu.trace_start"() <{level = 10 : i32, message = "hnd,hkd->hnk"}> : () -> ()
    %cst_22 = arith.constant dense<0.000000e+00> : vector<4x16x32xf32>
    %40 = tpu.matmul %32, %39, %cst_22 {dimension_numbers = #tpu.dot_dimension_numbers<[2], [2], [1], [1], [0, 0, 0, 1, 1, 1], [0], [0]>} : vector<4x16x128xbf16>, vector<4x32x128xbf16>, vector<4x16x32xf32> -> vector<4x16x32xf32>
    "tpu.trace_stop"() : () -> ()
    %c0_23 = arith.constant 0 : index
    %c0_24 = arith.constant 0 : index
    %c0_25 = arith.constant 0 : index
    %c0_26 = arith.constant 0 : index
    %41 = vector.load %arg10[%c0_23, %c0_24, %c0_25, %c0_26] : memref<1x4x32x128xbf16, #tpu.memory_space<vmem>>, vector<1x4x32x128xbf16>
    %42 = vector.shape_cast %41 : vector<1x4x32x128xbf16> to vector<4x32x128xbf16>
    "tpu.trace_start"() <{level = 10 : i32, message = "hnd,hkd->hnk"}> : () -> ()
    %cst_27 = arith.constant dense<0.000000e+00> : vector<4x16x32xf32>
    %43 = tpu.matmul %32, %42, %cst_27 {dimension_numbers = #tpu.dot_dimension_numbers<[2], [2], [1], [1], [0, 0, 0, 1, 1, 1], [0], [0]>} : vector<4x16x128xbf16>, vector<4x32x128xbf16>, vector<4x16x32xf32> -> vector<4x16x32xf32>
    "tpu.trace_stop"() : () -> ()
    %44 = arith.truncf %37 : vector<4x16x32xf32> to vector<4x16x32xbf16>
    %45 = arith.truncf %40 : vector<4x16x32xf32> to vector<4x16x32xbf16>
    "tpu.trace_start"() <{level = 10 : i32, message = "hqd,hkd->hqk"}> : () -> ()
    %cst_28 = arith.constant dense<0.000000e+00> : vector<4x16x16xf32>
    %46 = tpu.matmul %44, %45, %cst_28 {dimension_numbers = #tpu.dot_dimension_numbers<[2], [2], [1], [1], [0, 0, 0, 1, 1, 1], [0], [0]>} : vector<4x16x32xbf16>, vector<4x16x32xbf16>, vector<4x16x16xf32> -> vector<4x16x16xf32>
    "tpu.trace_stop"() : () -> ()
    %cst_29 = arith.constant dense<0xFF800000> : vector<4x16xf32>
    %47 = vector.multi_reduction <maximumf>, %46, %cst_29 [2] : vector<4x16x16xf32> to vector<4x16xf32>
    %48 = vector.shape_cast %47 : vector<4x16xf32> to vector<4x16x1xf32>
    %49 = vector.broadcast %48 : vector<4x16x1xf32> to vector<4x16x16xf32>
    %50 = arith.subf %46, %49 : vector<4x16x16xf32>
    %51 = math.exp %50 : vector<4x16x16xf32>
    %cst_30 = arith.constant dense<0.000000e+00> : vector<4x16xf32>
    %52 = vector.multi_reduction <add>, %51, %cst_30 [2] : vector<4x16x16xf32> to vector<4x16xf32>
    %53 = vector.shape_cast %52 : vector<4x16xf32> to vector<4x16x1xf32>
    %54 = tpu.reciprocal %53 {approx = true} : vector<4x16x1xf32> -> vector<4x16x1xf32>
    %55 = vector.broadcast %54 : vector<4x16x1xf32> to vector<4x16x16xf32>
    %56 = arith.mulf %51, %55 : vector<4x16x16xf32>
    %57 = arith.truncf %56 : vector<4x16x16xf32> to vector<4x16x16xbf16>
    %58 = arith.truncf %43 : vector<4x16x32xf32> to vector<4x16x32xbf16>
    "tpu.trace_start"() <{level = 10 : i32, message = "hqk,hkd->hqd"}> : () -> ()
    %cst_31 = arith.constant dense<0.000000e+00> : vector<4x16x32xf32>
    %59 = tpu.matmul %57, %58, %cst_31 {dimension_numbers = #tpu.dot_dimension_numbers<[2], [1], [1], [2], [0, 0, 0, 1, 1, 2], [0], [0]>} : vector<4x16x16xbf16>, vector<4x16x32xbf16>, vector<4x16x32xf32> -> vector<4x16x32xf32>
    "tpu.trace_stop"() : () -> ()
    %60 = arith.truncf %59 : vector<4x16x32xf32> to vector<4x16x32xbf16>
    %c0_32 = arith.constant 0 : index
    %c0_33 = arith.constant 0 : index
    %c0_34 = arith.constant 0 : index
    %c0_35 = arith.constant 0 : index
    %61 = vector.load %arg11[%c0_32, %c0_33, %c0_34, %c0_35] : memref<1x4x32x128xbf16, #tpu.memory_space<vmem>>, vector<1x4x32x128xbf16>
    %62 = vector.shape_cast %61 : vector<1x4x32x128xbf16> to vector<4x32x128xbf16>
    "tpu.trace_start"() <{level = 10 : i32, message = "hnd,hde->hne"}> : () -> ()
    %cst_36 = arith.constant dense<0.000000e+00> : vector<4x16x128xf32>
    %63 = tpu.matmul %60, %62, %cst_36 {dimension_numbers = #tpu.dot_dimension_numbers<[2], [1], [1], [2], [0, 0, 0, 1, 1, 2], [0], [0]>} : vector<4x16x32xbf16>, vector<4x32x128xbf16>, vector<4x16x128xf32> -> vector<4x16x128xf32>
    "tpu.trace_stop"() : () -> ()
    %cst_37 = arith.constant dense<0.000000e+00> : vector<16x128xf32>
    %64 = vector.multi_reduction <add>, %63, %cst_37 [0] : vector<4x16x128xf32> to vector<16x128xf32>
    %65 = arith.addf %3, %64 : vector<16x128xf32>
    %c0_38 = arith.constant 0 : index
    %c0_39 = arith.constant 0 : index
    %c0_40 = arith.constant 0 : index
    %66 = vector.load %arg12[%c0_38, %c0_39, %c0_40] : memref<1x1x128xf32, #tpu.memory_space<vmem>>, vector<1x1x128xf32>
    %67 = vector.shape_cast %66 : vector<1x1x128xf32> to vector<1x128xf32>
    %c0_41 = arith.constant 0 : index
    %c0_42 = arith.constant 0 : index
    %c0_43 = arith.constant 0 : index
    %68 = vector.load %arg13[%c0_41, %c0_42, %c0_43] : memref<1x1x128xf32, #tpu.memory_space<vmem>>, vector<1x1x128xf32>
    %69 = vector.shape_cast %68 : vector<1x1x128xf32> to vector<1x128xf32>
    %cst_44 = arith.constant dense<0.000000e+00> : vector<16xf32>
    %70 = vector.multi_reduction <add>, %65, %cst_44 [1] : vector<16x128xf32> to vector<16xf32>
    %71 = vector.shape_cast %70 : vector<16xf32> to vector<16x1xf32>
    %cst_45 = arith.constant 1.280000e+02 : f32
    %72 = vector.broadcast %cst_45 : f32 to vector<16x1xf32>
    %73 = arith.divf %71, %72 : vector<16x1xf32>
    %74 = vector.broadcast %73 : vector<16x1xf32> to vector<16x128xf32>
    %75 = arith.subf %65, %74 : vector<16x128xf32>
    %76 = arith.mulf %75, %75 : vector<16x128xf32>
    %cst_46 = arith.constant dense<0.000000e+00> : vector<16xf32>
    %77 = vector.multi_reduction <add>, %76, %cst_46 [1] : vector<16x128xf32> to vector<16xf32>
    %78 = vector.shape_cast %77 : vector<16xf32> to vector<16x1xf32>
    %cst_47 = arith.constant 1.280000e+02 : f32
    %79 = vector.broadcast %cst_47 : f32 to vector<16x1xf32>
    %80 = arith.divf %78, %79 : vector<16x1xf32>
    %81 = vector.broadcast %73 : vector<16x1xf32> to vector<16x128xf32>
    %82 = arith.subf %65, %81 : vector<16x128xf32>
    %cst_48 = arith.constant 9.99999974E-6 : f32
    %83 = vector.broadcast %cst_48 : f32 to vector<16x1xf32>
    %84 = arith.addf %80, %83 : vector<16x1xf32>
    %85 = math.rsqrt %84 : vector<16x1xf32>
    %86 = vector.broadcast %85 : vector<16x1xf32> to vector<16x128xf32>
    %87 = arith.mulf %82, %86 : vector<16x128xf32>
    %88 = vector.broadcast %67 : vector<1x128xf32> to vector<16x128xf32>
    %89 = arith.mulf %87, %88 : vector<16x128xf32>
    %90 = vector.broadcast %69 : vector<1x128xf32> to vector<16x128xf32>
    %91 = arith.addf %89, %90 : vector<16x128xf32>
    %92 = arith.truncf %91 : vector<16x128xf32> to vector<16x128xbf16>
    %c0_49 = arith.constant 0 : index
    %c0_50 = arith.constant 0 : index
    %c0_51 = arith.constant 0 : index
    %93 = vector.load %arg14[%c0_49, %c0_50, %c0_51] : memref<1x128x256xbf16, #tpu.memory_space<vmem>>, vector<1x128x256xbf16>
    %94 = vector.shape_cast %93 : vector<1x128x256xbf16> to vector<128x256xbf16>
    %cst_52 = arith.constant dense<0.000000e+00> : vector<16x256xf32>
    %95 = tpu.matmul %92, %94, %cst_52 {dimension_numbers = #tpu.dot_dimension_numbers<[1], [0], [0], [1], [0, 0, 1, 1], [], []>} : vector<16x128xbf16>, vector<128x256xbf16>, vector<16x256xf32> -> vector<16x256xf32>
    %c0_53 = arith.constant 0 : index
    %c0_54 = arith.constant 0 : index
    %c0_55 = arith.constant 0 : index
    %96 = vector.load %arg15[%c0_53, %c0_54, %c0_55] : memref<1x1x256xf32, #tpu.memory_space<vmem>>, vector<1x1x256xf32>
    %97 = vector.shape_cast %96 : vector<1x1x256xf32> to vector<1x256xf32>
    %98 = vector.broadcast %97 : vector<1x256xf32> to vector<16x256xf32>
    %99 = arith.addf %95, %98 : vector<16x256xf32>
    %cst_56 = arith.constant 5.000000e-01 : f32
    %100 = vector.broadcast %cst_56 : f32 to vector<16x256xf32>
    %101 = arith.mulf %100, %99 : vector<16x256xf32>
    %cst_57 = arith.constant 0.707106769 : f32
    %102 = vector.broadcast %cst_57 : f32 to vector<16x256xf32>
    %103 = arith.mulf %99, %102 : vector<16x256xf32>
    %104 = math.erf %103 : vector<16x256xf32>
    %cst_58 = arith.constant 1.000000e+00 : f32
    %105 = vector.broadcast %cst_58 : f32 to vector<16x256xf32>
    %106 = arith.addf %105, %104 : vector<16x256xf32>
    %107 = arith.mulf %101, %106 : vector<16x256xf32>
    %108 = arith.truncf %107 : vector<16x256xf32> to vector<16x256xbf16>
    %c0_59 = arith.constant 0 : index
    %c0_60 = arith.constant 0 : index
    %c0_61 = arith.constant 0 : index
    %109 = vector.load %arg16[%c0_59, %c0_60, %c0_61] : memref<1x256x128xbf16, #tpu.memory_space<vmem>>, vector<1x256x128xbf16>
    %110 = vector.shape_cast %109 : vector<1x256x128xbf16> to vector<256x128xbf16>
    %cst_62 = arith.constant dense<0.000000e+00> : vector<16x128xf32>
    %111 = tpu.matmul %108, %110, %cst_62 {dimension_numbers = #tpu.dot_dimension_numbers<[1], [0], [0], [1], [0, 0, 1, 1], [], []>} : vector<16x256xbf16>, vector<256x128xbf16>, vector<16x128xf32> -> vector<16x128xf32>
    %112 = arith.addf %65, %111 : vector<16x128xf32>
    %c0_63 = arith.constant 0 : index
    %c0_64 = arith.constant 0 : index
    %c0_65 = arith.constant 0 : index
    %113 = vector.load %arg17[%c0_63, %c0_64, %c0_65] : memref<1x1x128xf32, #tpu.memory_space<vmem>>, vector<1x1x128xf32>
    %114 = vector.shape_cast %113 : vector<1x1x128xf32> to vector<1x128xf32>
    %115 = vector.broadcast %114 : vector<1x128xf32> to vector<16x128xf32>
    %116 = arith.addf %112, %115 : vector<16x128xf32>
    %c0_66 = arith.constant 0 : index
    %c0_67 = arith.constant 0 : index
    %117 = vector.load %arg23[%c0_66, %c0_67] : memref<16x128xf32, #tpu.memory_space<vmem>>, vector<16x128xf32>
    tpu.vector_store %arg23[%c0_66, %c0_67], %116 {strides = array<i32>} : memref<16x128xf32, #tpu.memory_space<vmem>>, vector<16x128xf32>,
    %c1_i32 = arith.constant 1 : i32
    %118 = arith.cmpi eq, %arg1, %c1_i32 : i32
    %119 = arith.extui %118 : i1 to i32
    %c0_i32_68 = arith.constant 0 : i32
    %120 = arith.cmpi ne, %119, %c0_i32_68 : i32
    scf.if %120 {
      %cst_69 = arith.constant dense<0.000000e+00> : vector<128xf32>
      %121 = vector.multi_reduction <add>, %116, %cst_69 [0] : vector<16x128xf32> to vector<128xf32>
      %122 = vector.shape_cast %121 : vector<128xf32> to vector<1x128xf32>
      %cst_70 = arith.constant 1.600000e+01 : f32
      %123 = vector.broadcast %cst_70 : f32 to vector<1x128xf32>
      %124 = arith.divf %122, %123 : vector<1x128xf32>
      %c0_71 = arith.constant 0 : index
      %c0_72 = arith.constant 0 : index
      %125 = vector.load %arg18[%c0_71, %c0_72] : memref<1x128xf32, #tpu.memory_space<vmem>>, vector<1x128xf32>
      %c0_73 = arith.constant 0 : index
      %c0_74 = arith.constant 0 : index
      %126 = vector.load %arg19[%c0_73, %c0_74] : memref<1x128xf32, #tpu.memory_space<vmem>>, vector<1x128xf32>
      %cst_75 = arith.constant dense<0.000000e+00> : vector<1xf32>
      %127 = vector.multi_reduction <add>, %124, %cst_75 [1] : vector<1x128xf32> to vector<1xf32>
      %128 = vector.shape_cast %127 : vector<1xf32> to vector<1x1xf32>
      %cst_76 = arith.constant 1.280000e+02 : f32
      %129 = vector.broadcast %cst_76 : f32 to vector<1x1xf32>
      %130 = arith.divf %128, %129 : vector<1x1xf32>
      %131 = vector.broadcast %130 : vector<1x1xf32> to vector<1x128xf32>
      %132 = arith.subf %124, %131 : vector<1x128xf32>
      %133 = arith.mulf %132, %132 : vector<1x128xf32>
      %cst_77 = arith.constant dense<0.000000e+00> : vector<1xf32>
      %134 = vector.multi_reduction <add>, %133, %cst_77 [1] : vector<1x128xf32> to vector<1xf32>
      %135 = vector.shape_cast %134 : vector<1xf32> to vector<1x1xf32>
      %cst_78 = arith.constant 1.280000e+02 : f32
      %136 = vector.broadcast %cst_78 : f32 to vector<1x1xf32>
      %137 = arith.divf %135, %136 : vector<1x1xf32>
      %138 = vector.broadcast %130 : vector<1x1xf32> to vector<1x128xf32>
      %139 = arith.subf %124, %138 : vector<1x128xf32>
      %cst_79 = arith.constant 9.99999974E-6 : f32
      %140 = vector.broadcast %cst_79 : f32 to vector<1x1xf32>
      %141 = arith.addf %137, %140 : vector<1x1xf32>
      %142 = math.rsqrt %141 : vector<1x1xf32>
      %143 = vector.broadcast %142 : vector<1x1xf32> to vector<1x128xf32>
      %144 = arith.mulf %139, %143 : vector<1x128xf32>
      %145 = arith.mulf %144, %125 : vector<1x128xf32>
      %146 = arith.addf %145, %126 : vector<1x128xf32>
      %147 = arith.truncf %146 : vector<1x128xf32> to vector<1x128xbf16>
      %c0_80 = arith.constant 0 : index
      %c0_81 = arith.constant 0 : index
      %148 = vector.load %arg20[%c0_80, %c0_81] : memref<128x10xbf16, #tpu.memory_space<vmem>>, vector<128x10xbf16>
      %cst_82 = arith.constant dense<0.000000e+00> : vector<1x10xf32>
      %149 = tpu.matmul %147, %148, %cst_82 {dimension_numbers = #tpu.dot_dimension_numbers<[1], [0], [0], [1], [0, 0, 1, 1], [], []>} : vector<1x128xbf16>, vector<128x10xbf16>, vector<1x10xf32> -> vector<1x10xf32>
      %c0_83 = arith.constant 0 : index
      %c0_84 = arith.constant 0 : index
      %150 = vector.load %arg21[%c0_83, %c0_84] : memref<1x10xf32, #tpu.memory_space<vmem>>, vector<1x10xf32>
      %151 = arith.addf %149, %150 : vector<1x10xf32>
      %c0_85 = arith.constant 0 : index
      %c0_86 = arith.constant 0 : index
      %c0_87 = arith.constant 0 : index
      %152 = vector.load %arg22[%c0_85, %c0_86, %c0_87] : memref<1x1x10xf32, #tpu.memory_space<vmem>>, vector<1x1x10xf32>
      %153 = vector.shape_cast %152 : vector<1x1x10xf32> to vector<1x10xf32>
      %154 = vector.shape_cast %151 : vector<1x10xf32> to vector<1x1x10xf32>
      tpu.vector_store %arg22[%c0_85, %c0_86, %c0_87], %154 {strides = array<i32>} : memref<1x1x10xf32, #tpu.memory_space<vmem>>, vector<1x1x10xf32>,
    } else {
    }
    return
  }
  func.func @transform_0(%arg0: i32, %arg1: i32) -> (i32, i32, i32) {
    %c0_i32 = arith.constant 0 : i32
    %c0_i32_0 = arith.constant 0 : i32
    %c0_i32_1 = arith.constant 0 : i32
    return %arg0, %c0_i32, %c0_i32_0 : i32, i32, i32
  }
  func.func @transform_1(%arg0: i32, %arg1: i32) -> (i32, i32) {
    %c0_i32 = arith.constant 0 : i32
    %c0_i32_0 = arith.constant 0 : i32
    %c0_i32_1 = arith.constant 0 : i32
    return %c0_i32, %c0_i32_0 : i32, i32
  }
  func.func @transform_2(%arg0: i32, %arg1: i32) -> (i32, i32) {
    %c0_i32 = arith.constant 0 : i32
    %c0_i32_0 = arith.constant 0 : i32
    %c0_i32_1 = arith.constant 0 : i32
    return %c0_i32, %c0_i32_0 : i32, i32
  }
  func.func @transform_3(%arg0: i32, %arg1: i32) -> (i32, i32) {
    %c0_i32 = arith.constant 0 : i32
    %c0_i32_0 = arith.constant 0 : i32
    %c0_i32_1 = arith.constant 0 : i32
    return %c0_i32, %c0_i32_0 : i32, i32
  }
  func.func @transform_4(%arg0: i32, %arg1: i32) -> (i32, i32, i32) {
    %c0_i32 = arith.constant 0 : i32
    %c0_i32_0 = arith.constant 0 : i32
    %c0_i32_1 = arith.constant 0 : i32
    return %arg1, %c0_i32, %c0_i32_0 : i32, i32, i32
  }
  func.func @transform_5(%arg0: i32, %arg1: i32) -> (i32, i32, i32) {
    %c0_i32 = arith.constant 0 : i32
    %c0_i32_0 = arith.constant 0 : i32
    %c0_i32_1 = arith.constant 0 : i32
    return %arg1, %c0_i32, %c0_i32_0 : i32, i32, i32
  }
  func.func @transform_6(%arg0: i32, %arg1: i32) -> (i32, i32, i32, i32) {
    %c0_i32 = arith.constant 0 : i32
    %c0_i32_0 = arith.constant 0 : i32
    %c0_i32_1 = arith.constant 0 : i32
    %c0_i32_2 = arith.constant 0 : i32
    return %arg1, %c0_i32, %c0_i32_0, %c0_i32_1 : i32, i32, i32, i32
  }
  func.func @transform_7(%arg0: i32, %arg1: i32) -> (i32, i32, i32, i32) {
    %c0_i32 = arith.constant 0 : i32
    %c0_i32_0 = arith.constant 0 : i32
    %c0_i32_1 = arith.constant 0 : i32
    %c0_i32_2 = arith.constant 0 : i32
    return %arg1, %c0_i32, %c0_i32_0, %c0_i32_1 : i32, i32, i32, i32
  }
  func.func @transform_8(%arg0: i32, %arg1: i32) -> (i32, i32, i32, i32) {
    %c0_i32 = arith.constant 0 : i32
    %c0_i32_0 = arith.constant 0 : i32
    %c0_i32_1 = arith.constant 0 : i32
    %c0_i32_2 = arith.constant 0 : i32
    return %arg1, %c0_i32, %c0_i32_0, %c0_i32_1 : i32, i32, i32, i32
  }
  func.func @transform_9(%arg0: i32, %arg1: i32) -> (i32, i32, i32, i32) {
    %c0_i32 = arith.constant 0 : i32
    %c0_i32_0 = arith.constant 0 : i32
    %c0_i32_1 = arith.constant 0 : i32
    %c0_i32_2 = arith.constant 0 : i32
    return %arg1, %c0_i32, %c0_i32_0, %c0_i32_1 : i32, i32, i32, i32
  }
  func.func @transform_10(%arg0: i32, %arg1: i32) -> (i32, i32, i32) {
    %c0_i32 = arith.constant 0 : i32
    %c0_i32_0 = arith.constant 0 : i32
    %c0_i32_1 = arith.constant 0 : i32
    return %arg1, %c0_i32, %c0_i32_0 : i32, i32, i32
  }
  func.func @transform_11(%arg0: i32, %arg1: i32) -> (i32, i32, i32) {
    %c0_i32 = arith.constant 0 : i32
    %c0_i32_0 = arith.constant 0 : i32
    %c0_i32_1 = arith.constant 0 : i32
    return %arg1, %c0_i32, %c0_i32_0 : i32, i32, i32
  }
  func.func @transform_12(%arg0: i32, %arg1: i32) -> (i32, i32, i32) {
    %c0_i32 = arith.constant 0 : i32
    %c0_i32_0 = arith.constant 0 : i32
    %c0_i32_1 = arith.constant 0 : i32
    return %arg1, %c0_i32, %c0_i32_0 : i32, i32, i32
  }
  func.func @transform_13(%arg0: i32, %arg1: i32) -> (i32, i32, i32) {
    %c0_i32 = arith.constant 0 : i32
    %c0_i32_0 = arith.constant 0 : i32
    %c0_i32_1 = arith.constant 0 : i32
    return %arg1, %c0_i32, %c0_i32_0 : i32, i32, i32
  }
  func.func @transform_14(%arg0: i32, %arg1: i32) -> (i32, i32, i32) {
    %c0_i32 = arith.constant 0 : i32
    %c0_i32_0 = arith.constant 0 : i32
    %c0_i32_1 = arith.constant 0 : i32
    return %arg1, %c0_i32, %c0_i32_0 : i32, i32, i32
  }
  func.func @transform_15(%arg0: i32, %arg1: i32) -> (i32, i32, i32) {
    %c0_i32 = arith.constant 0 : i32
    %c0_i32_0 = arith.constant 0 : i32
    %c0_i32_1 = arith.constant 0 : i32
    return %arg1, %c0_i32, %c0_i32_0 : i32, i32, i32
  }
  func.func @transform_16(%arg0: i32, %arg1: i32) -> (i32, i32) {
    %c0_i32 = arith.constant 0 : i32
    %c0_i32_0 = arith.constant 0 : i32
    %c0_i32_1 = arith.constant 0 : i32
    return %c0_i32, %c0_i32_0 : i32, i32
  }
  func.func @transform_17(%arg0: i32, %arg1: i32) -> (i32, i32) {
    %c0_i32 = arith.constant 0 : i32
    %c0_i32_0 = arith.constant 0 : i32
    %c0_i32_1 = arith.constant 0 : i32
    return %c0_i32, %c0_i32_0 : i32, i32
  }
  func.func @transform_18(%arg0: i32, %arg1: i32) -> (i32, i32) {
    %c0_i32 = arith.constant 0 : i32
    %c0_i32_0 = arith.constant 0 : i32
    %c0_i32_1 = arith.constant 0 : i32
    return %c0_i32, %c0_i32_0 : i32, i32
  }
  func.func @transform_19(%arg0: i32, %arg1: i32) -> (i32, i32) {
    %c0_i32 = arith.constant 0 : i32
    %c0_i32_0 = arith.constant 0 : i32
    %c0_i32_1 = arith.constant 0 : i32
    return %c0_i32, %c0_i32_0 : i32, i32
  }
  func.func @transform_20(%arg0: i32, %arg1: i32) -> (i32, i32, i32) {
    %c0_i32 = arith.constant 0 : i32
    %c0_i32_0 = arith.constant 0 : i32
    %c0_i32_1 = arith.constant 0 : i32
    return %arg0, %c0_i32, %c0_i32_0 : i32, i32, i32
  }
}

</mosaic_0001>

<bundles_post_ra>
// kernel: tpu_custom_call.1
= control target key start
LH: loop header
LB: loop body
LE: loop exit
PB: predicated region body
PF: predicated region fallthrough
CT: control target
= control target key end

     0   :  { %s5350_s0 = inlined_call_operand.vmem [shape: f32[2,16,48], index: 0, kind: input, shape index: {}]   ;;  %s5351_s1 = inlined_call_operand.vmem [shape: f32[16,128], index: 1, kind: input, shape index: {}]   ;;  %s5352_s2 = inlined_call_operand.vmem [shape: bf16[48,128], index: 2, kind: input, shape index: {}]   ;;  %s5353_s3 = inlined_call_operand.hbm [shape: f32[1,128], index: 3, kind: input, shape index: {}]   ;;  %s5354_s4 = inlined_call_operand.vmem [shape: f32[2,1,128], index: 4, kind: input, shape index: {}]   ;;  %s5355_s5 = inlined_call_operand.vmem [shape: f32[2,1,128], index: 5, kind: input, shape index: {}]   ;;  %s5356_s6 = inlined_call_operand.hbm [shape: bf16[2,4,32,128], index: 6, kind: input, shape index: {}]   ;;  %s5357_s7 = inlined_call_operand.hbm [shape: bf16[2,4,32,128], index: 7, kind: input, shape index: {}]   ;;  %s5358_s8 = inlined_call_operand.hbm [shape: bf16[2,4,32,128], index: 8, kind: input, shape index: {}]   ;;  %s5359_s9 = inlined_call_operand.hbm [shape: bf16[2,4,32,128], index: 9, kind: input, shape index: {}]   ;;  %s5360_s10 = inlined_call_operand.vmem [shape: f32[2,1,128], index: 10, kind: input, shape index: {}]   ;;  %s5361_s11 = inlined_call_operand.vmem [shape: f32[2,1,128], index: 11, kind: input, shape index: {}]   ;;  %s5362_s12 = inlined_call_operand.hbm [shape: bf16[2,128,256], index: 12, kind: input, shape index: {}]   ;;  %s5363_s13 = inlined_call_operand.vmem [shape: f32[2,1,256], index: 13, kind: input, shape index: {}]   ;;  %s5364_s14 = inlined_call_operand.hbm [shape: bf16[2,256,128], index: 14, kind: input, shape index: {}]   ;;  %s5365_s15 = inlined_call_operand.vmem [shape: f32[2,1,128], index: 15, kind: input, shape index: {}]   ;;  %s5366_s16 = inlined_call_operand.vmem [shape: f32[1,128], index: 16, kind: input, shape index: {}]   ;;  %s5367_s17 = inlined_call_operand.vmem [shape: f32[1,128], index: 17, kind: input, shape index: {}]   ;;  %s5368_s18 = inlined_call_operand.vmem [shape: bf16[128,10], index: 18, kind: input, shape index: {}]   ;;  %s5369_s19 = inlined_call_operand.vmem [shape: f32[1,10], index: 19, kind: input, shape index: {}]   ;;  %s5370_s20 = inlined_call_operand.hbm [shape: f32[2,1,10], index: 20, kind: output, shape index: {}]  }
   0x1   :  { %5409 = sst [smem:[#allocation37_spill]] %s5350_s0 }
   0x2   :  { %5410 = sst [smem:[#allocation38_spill]] %s5351_s1 }
   0x3   :  { %5411 = sst [smem:[#allocation39_spill]] %s5352_s2 }
   0x4   :  { %5412 = sst [smem:[#allocation40_spill]] %s5353_s3 }
   0x5   :  { %5413 = sst [smem:[#allocation41_spill]] %s5354_s4 }
   0x6   :  { %5414 = sst [smem:[#allocation42_spill]] %s5355_s5 }
   0x7   :  { %5415 = sst [smem:[#allocation43_spill]] %s5356_s6 }
   0x8   :  { %5416 = sst [smem:[#allocation44_spill]] %s5357_s7 }
   0x9   :  { %5417 = sst [smem:[#allocation45_spill]] %s5358_s8 }
   0xa   :  { %5418 = sst [smem:[#allocation46_spill]] %s5359_s9 }
   0xb   :  { %5419 = sst [smem:[#allocation47_spill]] %s5360_s10 }
   0xc   :  { %5420 = sst [smem:[#allocation48_spill]] %s5361_s11 }
   0xd   :  { %5421 = sst [smem:[#allocation49_spill]] %s5362_s12 }
   0xe   :  { %5422 = sst [smem:[#allocation50_spill]] %s5363_s13 }
   0xf   :  { %5423 = sst [smem:[#allocation51_spill]] %s5364_s14 }
  0x10   :  { %5424 = sst [smem:[#allocation52_spill]] %s5365_s15 }
  0x11   :  { %5425 = sst [smem:[#allocation53_spill]] %s5366_s16 }
  0x12   :  { %5426 = sst [smem:[#allocation54_spill]] %s5367_s17 }
  0x13   :  { %5427 = sst [smem:[#allocation55_spill]] %s5368_s18 }
  0x14   :  { %5428 = sst [smem:[#allocation56_spill]] %s5369_s19 }
  0x15   :  { %5429 = sst [smem:[#allocation57_spill]] %s5370_s20 }
  0x16   :  { %25 = vsyncpa [#allocation4], 0 }
  0x17   :  { %26 = vsyncpa [#allocation7], 0 }
  0x18   :  { %28 = vsyncpa [#allocation7 + $0x1], 0 }
  0x19   :  { %29 = vsyncpa [#allocation10], 0 }
  0x1a   :  { %31 = vsyncpa [#allocation10 + $0x1], 0 }
  0x1b   :  { %32 = vsyncpa [#allocation13], 0 }
  0x1c   :  { %34 = vsyncpa [#allocation13 + $0x1], 0 }
  0x1d   :  { %35 = vsyncpa [#allocation5], 0 }
  0x1e   :  { %37 = vsyncpa [#allocation5 + $0x1], 0  ;;  %s4524_s1 = smov 0   ;;  %s4526_s22 = smov 0  }
  0x1f   :  { %s4528_s23 = smov 0   ;;  %s4530_s24 = smov 0  }
  0x20   :  { %s4532_s2 = smov 0   ;;  %s4534_s25 = smov 0  }
  0x21   :  { %s4536_s3 = smov 0   ;;  %s4538_s26 = smov 0  }
  0x22   :  { %s4540_s27 = smov 0   ;;  %s4542_s28 = smov 0  }
  0x23   :  { %s4544_s4 = smov 0  }
  0x24 LB: > { %5430 = sst [smem:[#allocation21_spill]] %s4358_s1  ;;  %s52_s29 = sadd.s32 1, %s4390_s27  ;;  %s4398_s4 = sphi %s4544_s4, %s43_s4   ;;  %s4394_s28 = sphi %s4542_s28, %s5517_s28   ;;  %s4390_s27 = sphi %s4540_s27, %s5516_s27   ;;  %s4386_s26 = sphi %s4538_s26, %s5515_s26   ;;  %s4382_s3 = sphi %s4536_s3, %s5514_s3   ;;  %s4378_s25 = sphi %s4534_s25, %s5513_s25   ;;  %s4374_s2 = sphi %s4532_s2, %s5512_s2   ;;  %s4370_s24 = sphi %s4530_s24, %s5511_s24   ;;  %s4366_s23 = sphi %s4528_s23, %s5510_s23   ;;  %s4362_s22 = sphi %s4526_s22, %s5519_s22   ;;  %s4358_s1 = sphi %s4524_s1, %s5518_s1  }
  0x25   : > { %5431 = sst [smem:[#allocation22_spill]] %s4366_s23  ;;  %s203_s30 = sadd.s32 1, %s4378_s25 }
  0x26   : > { %5432 = sst [smem:[#allocation23_spill]] %s4374_s2  ;;  %p4581_p0 = scmp.ge.s32.totalorder %s52_s29, 2 }
  0x27   : > { %5433 = sst [smem:[#allocation24_spill]] %s4378_s25  ;;  %p210_p1 = scmp.ne.s32.totalorder %s4378_s25, %s4374_s2 }
  0x28   : > { %5434 = sst [smem:[#allocation25_spill]] %s4382_s3  ;;  %p211_p2 = scmp.eq.s32.totalorder %s4398_s4, 0 }
  0x29   : > { %5435 = sst [smem:[#allocation26_spill]] %s4386_s26  ;;  %s5521_s29 = smov (%p4581_p0, %s52_s29), 0 }
  0x2a   : > { %5436 = sst [smem:[#allocation27_spill]] %s4390_s27  ;;  %p212_p3 = por %p211_p2, %p210_p1 }
  0x2b   : > { %5437 = sst [smem:[#allocation28_spill]] %s4394_s28  ;;  %p3818_p4 = scmp.lt.s32.totalorder %s4398_s4, 4 }
  0x2c   : > { %5438 = sst [smem:[#allocation29_spill]] %s4398_s4  ;;  %s200_s21 = ssub.s32 %s4390_s27, %s5521_s29 }
  0x2d   : > { %s5439_s0 = scalar_select %p4581_p0, 1, 0 }
  0x2e   : > { %5440 = sst [smem:[#allocation30_spill]] %s5521_s29  ;;  %s4596_s20 = sand.u32 1, %s4398_s4  }
  0x2f   : > { %p201_p5 = scmp.eq.s32.totalorder %s200_s21, 0  ;;  %s5377_s19 = sand.u32 1, %s4378_s25  }
  0x30   : > { %s4600_s17 = sshll.u32 %s4390_s27, 10  ;;  %s4607_s18 = sshll.u32 %s5377_s19, 6 }
  0x31   : > { %s4603_s16 = scalar_select %p201_p5, %s4378_s25, %s203_s30  }
  0x32   : > { %s5442_s6 = sld [smem:[#allocation43_spill]]  ;;  %p4615_p6 = pnand %p3818_p4, %p212_p3 }
  0x33   : > { %5441 = sst [smem:[#allocation31_spill]] %s4603_s16  ;;  %s637_s30 = scalar_lea.vmem [#allocation6], %s4607_s18 }
  0x34   : > { %s644_s29 = sshll.u32 %s637_s30, 4  ;;  %p4627_p8 = pneg %p4615_p6  ;;  %s4620_s29 = int_to_ptr.vmem [resolvable:$true] %s644_s29 }
  0x38   : > { %s4613_s11 = scalar_lea.hbm %s5442_s6, %s4600_s17  ;;  %s4061_s5 = scalar_lea.hbm %s5442_s6, 2048 }
  0x39   : > { %s4056_s16 = scalar_lea.hbm %s4613_s11, 1024  ;;  %p4062_p11 = scmp.lt.u32.totalorder %s4613_s11, %s5442_s6 }
  0x3a   : > { %p4057_p7 = scmp.ne.s32.totalorder %s4613_s11, %s4056_s16  ;;  %p4063_p12 = scmp.lt.u32.totalorder %s4061_s5, %s4056_s16 }
  0x3b   : > { %p4065_p1 = scmp.lt.u32.totalorder %s4056_s16, %s4613_s11 }
  0x3c   : > { %p4059_p9 = pnand %p4627_p8, %p4057_p7  ;;  %p4064_p13 = por %p4063_p12, %p4062_p11 }
  0x3e   : > { %p4060_p10 = pneg %p4059_p9  ;;  %p4066_p2 = por %p4065_p1, %p4064_p13 }
  0x40   : > { %p4067_p3 = pnand %p4066_p2, %p4060_p10 }
  0x42   : > { %4070 = shalt.err (!%p4067_p3)
}
  0x43   : > { %s4071_s19 = scalar_lea.vmem %s4620_s29, 1024  ;;  %s4400_s10 = smov [#allocation6]  }
  0x44   : > { %p4072_p4 = scmp.ne.s32.totalorder %s4620_s29, %s4071_s19  ;;  %s4076_s15 = sshll.u32 %s4400_s10, 4  ;;  %s4077_s15 = int_to_ptr.vmem [resolvable:$false] %s4076_s15 }
  0x45   : > { %s4078_s3 = scalar_lea.vmem %s4077_s15, 2048  ;;  %p4079_p9 = scmp.lt.s32.totalorder %s4620_s29, %s4077_s15 }
  0x46   : > { %p4074_p5 = pnand %p4072_p4, %p4627_p8  ;;  %p4080_p0 = scmp.lt.s32.totalorder %s4078_s3, %s4071_s19 }
  0x48   : > { %p4075_p7 = pneg %p4074_p5  ;;  %p4081_p11 = por %p4080_p0, %p4079_p9 }
  0x4a   : > { %p4082_p12 = pnand %p4081_p11, %p4075_p7 }
  0x4c   : > { %4085 = shalt.err (!%p4082_p12)
}
  0x4d   : > { %s5384_s5 = smov 64   ;;  %s5386_s16 = smov 4  }
  0x4e   : > { %s5445_s30 = scalar_lea.sflag [#allocation7], %s4596_s20  ;;  %s5446_s8 = sld [smem:[#allocation45_spill]] }
  0x4f   : > { %3797 = dma.hbm_to_vmem [thread:$0]  (!%p4615_p6), %s4613_s11, 1024, %s4620_s29, %s5445_s30, %s5384_s5, %s5384_s5, %s5386_s16  }
  0x50   : > { %s679_s3 = scalar_lea.vmem [#allocation9], %s4607_s18  ;;  %s5447_s26 = sand.u32 1, %s4378_s25  }
  0x51   : > { %s686_s6 = sshll.u32 %s679_s3, 4  ;;  %s4666_s9 = sshll.u32 %s5447_s26, 7  ;;  %s4662_s6 = int_to_ptr.vmem [resolvable:$true] %s686_s6 }
  0x52   : > { %s5383_s7 = scalar_lea.sflag [#allocation10], %s4596_s20 }
  0x54   : > { %s4659_s15 = scalar_lea.hbm %s5446_s8, %s4600_s17  ;;  %s4091_s30 = scalar_lea.hbm %s5446_s8, 2048 }
  0x55   : > { %s4086_s1 = scalar_lea.hbm %s4659_s15, 1024  ;;  %p4092_p1 = scmp.lt.u32.totalorder %s4659_s15, %s5446_s8 }
  0x56   : > { %p4087_p0 = scmp.ne.s32.totalorder %s4659_s15, %s4086_s1  ;;  %p4093_p2 = scmp.lt.u32.totalorder %s4091_s30, %s4086_s1 }
  0x57   : > { %p4095_p4 = scmp.lt.u32.totalorder %s4086_s1, %s4659_s15 }
  0x58   : > { %p4089_p10 = pnand %p4087_p0, %p4627_p8  ;;  %p4094_p3 = por %p4093_p2, %p4092_p1 }
  0x5a   : > { %p4090_p13 = pneg %p4089_p10  ;;  %p4096_p5 = por %p4095_p4, %p4094_p3 }
  0x5c   : > { %p4097_p7 = pnand %p4096_p5, %p4090_p13 }
  0x5e   : > { %4100 = shalt.err (!%p4097_p7)
}
  0x5f   : > { %s4101_s26 = scalar_lea.vmem %s4662_s6, 1024  ;;  %s4403_s3 = smov [#allocation9]  }
  0x60   : > { %p4102_p9 = scmp.ne.s32.totalorder %s4662_s6, %s4101_s26  ;;  %s4106_s11 = sshll.u32 %s4403_s3, 4  ;;  %s4107_s11 = int_to_ptr.vmem [resolvable:$false] %s4106_s11 }
  0x61   : > { %s4108_s29 = scalar_lea.vmem %s4107_s11, 2048  ;;  %p4109_p0 = scmp.lt.s32.totalorder %s4662_s6, %s4107_s11 }
  0x62   : > { %p4104_p11 = pnand %p4102_p9, %p4627_p8  ;;  %p4110_p10 = scmp.lt.s32.totalorder %s4108_s29, %s4101_s26 }
  0x64   : > { %p4105_p12 = pneg %p4104_p11  ;;  %p4111_p1 = por %p4110_p10, %p4109_p0 }
  0x66   : > { %p4112_p2 = pnand %p4111_p1, %p4105_p12 }
  0x68   : > { %4115 = shalt.err (!%p4112_p2)
}
  0x69   : > { %3803 = dma.hbm_to_vmem [thread:$0]  (!%p4615_p6), %s4659_s15, 1024, %s4662_s6, %s5383_s7, %s5384_s5, %s5384_s5, %s5386_s16  }
  0x6a   : > { %s3464_s1 = sshll.u32 %s4390_s27, 11  ;;  %s5448_s12 = sld [smem:[#allocation49_spill]] }
  0x6b   : > { %s733_s26 = scalar_lea.vmem [#allocation12], %s4666_s9  ;;  %s5388_s11 = scalar_lea.sflag [#allocation13], %s4596_s20 }
  0x6c   : > { %s740_s3 = sshll.u32 %s733_s26, 4  ;;  %s4704_s3 = int_to_ptr.vmem [resolvable:$true] %s740_s3 }
  0x70   : > { %s4701_s10 = scalar_lea.hbm %s5448_s12, %s3464_s1  ;;  %s4121_s30 = scalar_lea.hbm %s5448_s12, 4096 }
  0x71   : > { %s4116_s29 = scalar_lea.hbm %s4701_s10, 2048  ;;  %p4122_p5 = scmp.lt.u32.totalorder %s4701_s10, %s5448_s12 }
  0x72   : > { %p4117_p13 = scmp.ne.s32.totalorder %s4701_s10, %s4116_s29  ;;  %p4123_p7 = scmp.lt.u32.totalorder %s4121_s30, %s4116_s29 }
  0x73   : > { %p4125_p11 = scmp.lt.u32.totalorder %s4116_s29, %s4701_s10 }
  0x74   : > { %p4119_p3 = pnand %p4117_p13, %p4627_p8  ;;  %p4124_p9 = por %p4123_p7, %p4122_p5 }
  0x76   : > { %p4120_p4 = pneg %p4119_p3  ;;  %p4126_p12 = por %p4125_p11, %p4124_p9 }
  0x78   : > { %p4127_p0 = pnand %p4126_p12, %p4120_p4 }
  0x7a   : > { %4130 = shalt.err (!%p4127_p0)
}
  0x7b   : > { %s4131_s26 = scalar_lea.vmem %s4704_s3, 2048  ;;  %s4404_s6 = smov [#allocation12]  }
  0x7c   : > { %p4132_p10 = scmp.ne.s32.totalorder %s4704_s3, %s4131_s26  ;;  %s4136_s15 = sshll.u32 %s4404_s6, 4  ;;  %s4137_s15 = int_to_ptr.vmem [resolvable:$false] %s4136_s15 }
  0x7d   : > { %s4138_s7 = scalar_lea.vmem %s4137_s15, 4096  ;;  %p4139_p13 = scmp.lt.s32.totalorder %s4704_s3, %s4137_s15 }
  0x7e   : > { %p4134_p1 = pnand %p4132_p10, %p4627_p8  ;;  %p4140_p3 = scmp.lt.s32.totalorder %s4138_s7, %s4131_s26 }
  0x80   : > { %p4135_p2 = pneg %p4134_p1  ;;  %p4141_p5 = por %p4140_p3, %p4139_p13 }
  0x82   : > { %p4142_p7 = pnand %p4141_p5, %p4135_p2 }
  0x84   : > { %4145 = shalt.err (!%p4142_p7)
}
  0x85   : > { %s4405_s29 = smov 128   ;;  %s4406_s30 = smov 8  }
  0x86   : > { %3809 = dma.hbm_to_vmem [thread:$0]  (!%p4615_p6), %s4701_s10, 2048, %s4704_s3, %s5388_s11, %s4405_s29, %s4405_s29, %s4406_s30  }
  0x87   : > { %s5449_s14 = sld [smem:[#allocation51_spill]]  ;;  %s761_s7 = scalar_lea.vmem [#allocation14], %s4666_s9 }
  0x88   : > { %s5450_s15 = sld [smem:[#allocation21_spill]]  ;;  %s768_s5 = sshll.u32 %s761_s7, 4  ;;  %s4738_s5 = int_to_ptr.vmem [resolvable:$true] %s768_s5 }
  0x89   : > { %s4741_s16 = sadd.s32 4294967295, %s4398_s4   ;;  %s3328_s8 = sadd.s32 4294967294, %s4398_s4  }
  0x8a   : > { %s55_s10 = sadd.s32 1, %s4394_s28  ;;  %p5451_p4 = scmp.ne.s32.totalorder %s5439_s0, 0 }
  0x8b   : > { %p216_p9 = scmp.ne.s32.totalorder %s4374_s2, %s4370_s24  ;;  %p5395_p11 = scmp.eq.s32.totalorder %s4741_s16, 0 }
  0x8c   : > { %s5523_s10 = smov (!%p5451_p4, %s55_s10), %s4394_s28  ;;  %s547_s9 = sadd.s32 1, %s4366_s23 }
  0x8d   : > { %s4735_s6 = scalar_lea.hbm %s5449_s14, %s3464_s1  ;;  %p57_p12 = scmp.ge.s32.totalorder %s5523_s10, 2 }
  0x8e   : > { %p4754_p0 = por %p5395_p11, %p216_p9  ;;  %p557_p10 = scmp.ne.s32.totalorder %s4366_s23, %s4362_s22 }
  0x8f   : > { %s5525_s10 = smov (%p57_p12, %s5523_s10), 0  ;;  %p558_p1 = scmp.eq.s32.totalorder %s4741_s16, 3 }
  0x90   : > { %s5452_s1 = scalar_select %p4754_p0, 1, 0 }
  0x91   : > { %5453 = sst [smem:[#allocation32_spill]] %s5525_s10  ;;  %p563_p2 = scmp.ne.s32.totalorder %s4362_s22, %s5450_s15 }
  0x92   : > { %s544_s0 = ssub.s32 %s4394_s28, %s5525_s10  ;;  %p564_p13 = scmp.eq.s32.totalorder %s3328_s8, 3 }
  0x93   : > { %p545_p3 = scmp.eq.s32.totalorder %s544_s0, 0  ;;  %p4767_p5 = por %p558_p1, %p557_p10 }
  0x94   : > { %p4771_p7 = por %p564_p13, %p563_p2  ;;  %p3329_p4 = scmp.ge.s32.totalorder %s4398_s4, 1 }
  0x95   : > { %s5454_s24 = scalar_select %p4767_p5, 1, 0 }
  0x96   : > { %s5456_s3 = scalar_select %p4771_p7, 1, 0 }
  0x97   : > { %5455 = sst [smem:[#allocation33_spill]] %s5454_s24  ;;  %p571_p9 = scmp.lt.s32.totalorder %s4398_s4, 5 }
  0x98   : > { %5457 = sst [smem:[#allocation34_spill]] %s5456_s3  ;;  %s4407_s8 = smov [#allocation3]  }
  0x99   : > { %s4777_s29 = scalar_select %p545_p3, %s4366_s23, %s547_s9  }
  0x9a   : > { %p4780_p12 = pnand %p3329_p4, %p571_p9  ;;  %s590_s19 = sshll.u32 %s4407_s8, 4  ;;  %s4784_s19 = int_to_ptr.vmem [resolvable:$true] %s590_s19 }
  0x9b   : > { %5458 = sst [smem:[#allocation35_spill]] %s4777_s29  ;;  %s5460_s7 = sld [smem:[#allocation44_spill]] }
  0x9c   : > { %s5459_s30 = scalar_select %p4780_p12, 1, 0 }
  0x9d   : > { %p3790_p10 = pneg %p4780_p12  ;;  %s658_s9 = scalar_lea.vmem [#allocation8], %s4607_s18 }
  0x9e   : > { %s665_s11 = sshll.u32 %s658_s9, 4  ;;  %s5462_s26 = sld [smem:[#allocation46_spill]]  ;;  %s4795_s11 = int_to_ptr.vmem [resolvable:$true] %s665_s11 }
  0x9f   : > { %p4799_p1 = pnand %p3790_p10, %p5395_p11 }
  0xa1   : > { %s4790_s0 = scalar_lea.hbm %s5460_s7, %s4600_s17  ;;  %s4151_s9 = scalar_lea.hbm %s5460_s7, 2048 }
  0xa2   : > { %s5461_s8 = scalar_select %p4799_p1, 1, 0 }
  0xa3   : > { %s4146_s27 = scalar_lea.hbm %s4790_s0, 1024  ;;  %p4152_p4 = scmp.lt.u32.totalorder %s4790_s0, %s5460_s7 }
  0xa4   : > { %s5463_s15 = smov %s5462_s26  ;;  %s4807_s28 = scalar_lea.hbm %s5462_s26, %s4600_s17 }
  0xa5   : > { %p4147_p2 = scmp.ne.s32.totalorder %s4790_s0, %s4146_s27  ;;  %p4153_p9 = scmp.lt.u32.totalorder %s4151_s9, %s4146_s27 }
  0xa6   : > { %p4155_p11 = scmp.lt.u32.totalorder %s4146_s27, %s4790_s0 }
  0xa7   : > { %p4149_p13 = pnand %p4147_p2, %p4627_p8  ;;  %p4154_p10 = por %p4153_p9, %p4152_p4 }
  0xa9   : > { %p4150_p3 = pneg %p4149_p13  ;;  %p4156_p7 = por %p4155_p11, %p4154_p10 }
  0xab   : > { %p4157_p5 = pnand %p4156_p7, %p4150_p3 }
  0xad   : > { %4160 = shalt.err (!%p4157_p5)
}
  0xae   : > { %s4161_s12 = scalar_lea.vmem %s4795_s11, 1024  ;;  %s4408_s17 = smov [#allocation8]  }
  0xaf   : > { %p4162_p2 = scmp.ne.s32.totalorder %s4795_s11, %s4161_s12  ;;  %s4166_s25 = sshll.u32 %s4408_s17, 4  ;;  %s4167_s25 = int_to_ptr.vmem [resolvable:$false] %s4166_s25 }
  0xb0   : > { %s4168_s23 = scalar_lea.vmem %s4167_s25, 2048  ;;  %p4169_p12 = scmp.lt.s32.totalorder %s4795_s11, %s4167_s25 }
  0xb1   : > { %p4164_p13 = pnand %p4162_p2, %p4627_p8  ;;  %p4170_p1 = scmp.lt.s32.totalorder %s4168_s23, %s4161_s12 }
  0xb3   : > { %p4165_p0 = pneg %p4164_p13  ;;  %p4171_p4 = por %p4170_p1, %p4169_p12 }
  0xb5   : > { %p4172_p9 = pnand %p4171_p4, %p4165_p0 }
  0xb7   : > { %4175 = shalt.err (!%p4172_p9)
}
  0xb8   : > { %s5464_s27 = smov 4   ;;  %s5465_s10 = smov 64  }
  0xb9   : > { %s5466_s3 = scalar_lea.sflag [#allocation7], %s4596_s20  ;;  %s700_s29 = scalar_lea.vmem [#allocation11], %s4607_s18 }
  0xba   : > { %3800 = dma.hbm_to_vmem [thread:$0]  (!%p4615_p6), %s4790_s0, 1024, %s4795_s11, %s5466_s3, %s5465_s10, %s5465_s10, %s5464_s27  }
  0xbb   : > { %s707_s26 = sshll.u32 %s700_s29, 4  ;;  %s5467_s12 = sld [smem:[#allocation40_spill]]  ;;  %s4858_s26 = int_to_ptr.vmem [resolvable:$true] %s707_s26 }
  0xbc   : > { %p5468_p0 = scmp.ne.s32.totalorder %s5461_s8, 0 }
  0xbe   : > { %p4178_p5 = pneg %p5468_p0 }
  0xc1   : > { %s4176_s25 = scalar_lea.hbm %s5467_s12, 16 }
  0xc2   : > { %p4177_p11 = scmp.ne.s32.totalorder %s5467_s12, %s4176_s25  ;;  %p4183_p1 = scmp.lt.u32.totalorder %s4176_s25, %s5467_s12 }
  0xc4   : > { %p4179_p7 = pnand %p4178_p5, %p4177_p11 }
  0xc6   : > { %p4180_p12 = pneg %p4179_p7 }
  0xc8   : > { %p4185_p3 = pnand %p4183_p1, %p4180_p12 }
  0xca   : > { %4188 = shalt.err (!%p4185_p3)
}
  0xcb   : > { %s4189_s18 = scalar_lea.vmem %s4784_s19, 16  ;;  %s4196_s11 = scalar_lea.vmem %s4784_s19, 32 }
  0xcc   : > { %p4190_p10 = scmp.ne.s32.totalorder %s4784_s19, %s4189_s18  ;;  %p4197_p4 = scmp.lt.s32.totalorder %s4784_s19, %s4784_s19 }
  0xcd   : > { %p4198_p9 = scmp.lt.s32.totalorder %s4196_s11, %s4189_s18 }
  0xce   : > { %p4192_p2 = pnand %p4190_p10, %p4178_p5 }
  0xcf   : > { %p4199_p11 = por %p4198_p9, %p4197_p4 }
  0xd0   : > { %p4193_p13 = pneg %p4192_p2 }
  0xd2   : > { %p4200_p7 = pnand %p4199_p11, %p4193_p13 }
  0xd4   : > { %4203 = shalt.err (!%p4200_p7)
}
  0xd5   : > { %3793 = dma.hbm_to_vmem [thread:$0]  (!%p5468_p0), %s5467_s12, 16, %s4784_s19, [#allocation4]  }
  0xd6   : > { %s4204_s7 = scalar_lea.hbm %s4807_s28, 1024  ;;  %s4209_s8 = scalar_lea.hbm %s5463_s15, 2048 }
  0xd7   : > { %p4205_p5 = scmp.ne.s32.totalorder %s4807_s28, %s4204_s7  ;;  %p4210_p3 = scmp.lt.u32.totalorder %s4807_s28, %s5463_s15 }
  0xd8   : > { %p4211_p10 = scmp.lt.u32.totalorder %s4209_s8, %s4204_s7  ;;  %p4213_p13 = scmp.lt.u32.totalorder %s4204_s7, %s4807_s28 }
  0xd9   : > { %p4207_p12 = pnand %p4205_p5, %p4627_p8 }
  0xda   : > { %p4212_p2 = por %p4211_p10, %p4210_p3 }
  0xdb   : > { %p4208_p1 = pneg %p4207_p12 }
  0xdc   : > { %p4214_p4 = por %p4213_p13, %p4212_p2 }
  0xde   : > { %p4215_p0 = pnand %p4214_p4, %p4208_p1 }
  0xe0   : > { %4218 = shalt.err (!%p4215_p0)
}
  0xe1   : > { %s4219_s19 = scalar_lea.vmem %s4858_s26, 1024  ;;  %s4409_s17 = smov [#allocation11]  }
  0xe2   : > { %p4220_p9 = scmp.ne.s32.totalorder %s4858_s26, %s4219_s19  ;;  %s4224_s25 = sshll.u32 %s4409_s17, 4  ;;  %s4225_s25 = int_to_ptr.vmem [resolvable:$false] %s4224_s25 }
  0xe3   : > { %s4226_s23 = scalar_lea.vmem %s4225_s25, 2048  ;;  %p4227_p5 = scmp.lt.s32.totalorder %s4858_s26, %s4225_s25 }
  0xe4   : > { %p4222_p11 = pnand %p4220_p9, %p4627_p8  ;;  %p4228_p12 = scmp.lt.s32.totalorder %s4226_s23, %s4219_s19 }
  0xe6   : > { %p4223_p7 = pneg %p4222_p11  ;;  %p4229_p3 = por %p4228_p12, %p4227_p5 }
  0xe8   : > { %p4230_p10 = pnand %p4229_p3, %p4223_p7 }
  0xea   : > { %4233 = shalt.err (!%p4230_p10)
}
  0xeb   : > { %s5469_s18 = scalar_lea.sflag [#allocation10], %s4596_s20  ;;  %s4234_s11 = scalar_lea.hbm %s4735_s6, 2048 }
  0xec   : > { %3806 = dma.hbm_to_vmem [thread:$0]  (!%p4615_p6), %s4807_s28, 1024, %s4858_s26, %s5469_s18, %s5465_s10, %s5465_s10, %s5464_s27  }
  0xed   : > { %p4235_p1 = scmp.ne.s32.totalorder %s4735_s6, %s4234_s11  ;;  %s4239_s7 = scalar_lea.hbm %s5449_s14, 4096 }
  0xee   : > { %p4240_p4 = scmp.lt.u32.totalorder %s4735_s6, %s5449_s14  ;;  %p4241_p0 = scmp.lt.u32.totalorder %s4239_s7, %s4234_s11 }
  0xef   : > { %p4237_p2 = pnand %p4235_p1, %p4627_p8  ;;  %p4243_p11 = scmp.lt.u32.totalorder %s4234_s11, %s4735_s6 }
  0xf0   : > { %p4242_p9 = por %p4241_p0, %p4240_p4 }
  0xf1   : > { %p4238_p13 = pneg %p4237_p2 }
  0xf2   : > { %p4244_p7 = por %p4243_p11, %p4242_p9 }
  0xf4   : > { %p4245_p5 = pnand %p4244_p7, %p4238_p13 }
  0xf6   : > { %4248 = shalt.err (!%p4245_p5)
}
  0xf7   : > { %s4249_s28 = scalar_lea.vmem %s4738_s5, 2048  ;;  %s4410_s26 = smov [#allocation14]  }
  0xf8   : > { %p4250_p12 = scmp.ne.s32.totalorder %s4738_s5, %s4249_s28  ;;  %s4254_s8 = sshll.u32 %s4410_s26, 4  ;;  %s4255_s8 = int_to_ptr.vmem [resolvable:$false] %s4254_s8 }
  0xf9   : > { %s4256_s29 = scalar_lea.vmem %s4255_s8, 4096  ;;  %p4257_p1 = scmp.lt.s32.totalorder %s4738_s5, %s4255_s8 }
  0xfa   : > { %p4252_p3 = pnand %p4250_p12, %p4627_p8  ;;  %p4258_p2 = scmp.lt.s32.totalorder %s4256_s29, %s4249_s28 }
  0xfc   : > { %p4253_p10 = pneg %p4252_p3  ;;  %p4259_p4 = por %p4258_p2, %p4257_p1 }
  0xfe   : > { %p4260_p0 = pnand %p4259_p4, %p4253_p10 }
 0x100   : > { %4263 = shalt.err (!%p4260_p0)
}
 0x101   : > { %s5470_s9 = scalar_lea.sflag [#allocation13], %s4596_s20  ;;  %p5471_p8 = scmp.ne.s32.totalorder %s5459_s30, 0 }
 0x102   : > { %3812 = dma.hbm_to_vmem [thread:$0]  (!%p4615_p6), %s4735_s6, 2048, %s4738_s5, %s5470_s9, %s5465_s10, %s5465_s10, %s5464_s27  }
 0x103   : > { %786 = sbr.rel (%p5471_p8) target bundleno = 3431 (0xd67), region = 100 }
 0x10a   : > { %p5472_p13 = scmp.eq.s32.totalorder %s4741_s16, 0 }
 0x10c   : > { %4337 = dma.done.wait (%p5472_p13), [#allocation4], 16   ;;  %p5473_p9 = pmov %p5472_p13 }
 0x10d   : > { %s792_s21 = sand.u32 1, %s4741_s16   ;;  %s794_s13 = sand.u32 1, %s4374_s2  }
 0x10e   : > { %4339 = vsyncadd (%p5473_p9), [#allocation4], 4294967280  ;;  %s3352_s19 = sshll.u32 %s794_s13, 6  ;;  %s793_s17 = scalar_lea.sflag [#allocation7], %s792_s21 }
 0x10f   : > { %s4920_s20 = scalar_lea.vmem [#allocation6], %s3352_s19  ;;  %p5474_p11 = scmp.ne.s32.totalorder %s5452_s1, 0 }
 0x111   : > { %4341 = dma.done.wait (%p5474_p11), %s793_s17, 2048  }
 0x112   : > { %4343 = vsyncadd (%p5474_p11), %s793_s17, 4294965248  ;;  %s4926_s5 = scalar_lea.vmem [#allocation8], %s3352_s19  ;;  %s811_s6 = scalar_lea.sflag [#allocation10], %s792_s21 }
 0x113   : > { %s4928_s30 = scalar_lea.vmem [#allocation9], %s3352_s19 }
 0x114   : > { %4345 = dma.done.wait (%p5474_p11), %s811_s6, 2048  }
 0x115   : > { %4347 = vsyncadd (%p5474_p11), %s811_s6, 4294965248  ;;  %s3356_s16 = sshll.u32 %s794_s13, 7  ;;  %s4934_s27 = scalar_lea.vmem [#allocation11], %s3352_s19 }
 0x116   : > { %s829_s10 = scalar_lea.sflag [#allocation13], %s792_s21  ;;  %s4936_s25 = scalar_lea.vmem [#allocation12], %s3356_s16 }
 0x117   : > { %5475 = sst [smem:[#allocation36_spill]] %s4936_s25 }
 0x118   : > { %4349 = dma.done.wait (%p5474_p11), %s829_s10, 4096  }
 0x119   : > { %4351 = vsyncadd (%p5474_p11), %s829_s10, 4294963200  ;;  %s5476_s23 = sld [smem:[#allocation26_spill]]  ;;  %s5477_s18 = sld [smem:[#allocation25_spill]] }
 0x11a   : > { %s5478_s0 = sld [smem:[#allocation37_spill]]  ;;  %s5479_s8 = sld [smem:[#allocation41_spill]] }
 0x11b   : > { %s5480_s13 = sld [smem:[#allocation42_spill]]  ;;  %s5481_s10 = sld [smem:[#allocation47_spill]] }
 0x11c   : > { %s5482_s15 = sld [smem:[#allocation48_spill]]  ;;  %s5484_s26 = sld [smem:[#allocation52_spill]] }
 0x11d   : > { %s4978_s9 = scalar_lea.vmem [#allocation14], %s3356_s16  ;;  %s5485_s21 = sand.u32 1, %s4362_s22  }
 0x11f   : > { %p946_p6 = scmp.lt.s32.totalorder %s5476_s23, 1  ;;  %p951_p7 = scmp.lt.s32.totalorder %s5477_s18, 1 }
 0x120   : > { %p3361_p5 = scmp.ne.s32.totalorder %s5477_s18, 0 }
 0x121   : > { %s5527_s23 = smov (!%p946_p6, %s5476_s23), 1  ;;  %s5486_s12 = sld [smem:[#allocation39_spill]] (!%p3361_p5)  ;;  %v4411_v1 = vmov (!%p3361_p5), 0.0   ;;  %vm4412_vm0 = vmmov (!%p3361_p5), 0   ;;  %vm1009_vm1 = vcmask (!%p3361_p5), 392192  }
 0x122   : > { %s4947_s4 = scalar_select %p951_p7, %s5477_s18, 1 }
 0x123   : > { %s3466_s1 = sshll.u32 %s5527_s23, 4  ;;  %3566 = vmatprep.subr.bf16.mxu0 (!%p3361_p5), %v4411_v1  ;;  %3572 = vmatprep.mubr.msk.bf16.mxu0 (!%p3361_p5), %vm4412_vm0, %v4411_v1  ;;  %v3362_v7 = vld [vmem:[#allocation3] ss:$0 sm:$0xff] (!%p3361_p5) }
 0x124   : > { %s950_s3 = scalar_lea.vmem %s5478_s0, %s3466_s1  ;;  %s953_s29 = scalar_lea.vmem %s5479_s8, %s4947_s4 }
 0x125   : > { %s956_s19 = scalar_lea.vmem %s5480_s13, %s4947_s4  ;;  %s959_s11 = scalar_lea.vmem %s5481_s10, %s4947_s4  ;;  %v975_v4 = vld [vmem:[%s950_s3] sm:$0xff] (!%p3361_p5)  ;;  %v976_v5 = vld [vmem:[%s950_s3 + $0x8] sm:$0xff] (!%p3361_p5) }
 0x126   : > { %s962_s23 = scalar_lea.vmem %s5482_s15, %s4947_s4  ;;  %s3360_s2 = sshll.u32 %s4947_s4, 1  ;;  %v977_v6 = vpack.c.bf16 (!%p3361_p5), %v976_v5, %v975_v4 }
 0x127   : > { %s5483_s1 = sld [smem:[#allocation50_spill]]  ;;  %s969_s8 = scalar_lea.vmem %s5484_s26, %s4947_s4  ;;  %v3921_v0 = vld [vmem:[%s5486_s12] sm:$0xff] (!%p3361_p5)   ;;  %v3922_v2 = vld [vmem:[%s5486_s12 + $0x8] sm:$0xff] (!%p3361_p5)   ;;  %v3923_v3 = vld [vmem:[%s5486_s12 + $0x10] sm:$0xff] (!%p3361_p5)  }
 0x128   : > { %s4982_s13 = scalar_lea.vmem [#allocation15], %s5485_s21  ;;  %974 = sbr.rel (%p3361_p5) target bundleno = 526 (0x20e), region = 132  ;;  %3567 = vmatpush3.bf16.msra.mxu0 (!%p3361_p5), %v3921_v0 }
 0x129   : > { %3568 = vmatprep.subr.bf16.mxu0 (!%p3361_p5), %v4411_v1  ;;  %s5487_s10 = sld [smem:[#allocation38_spill]] (!%p3361_p5) }
 0x12c   : > { %3569 = vmatpush3.bf16.msra.mxu0 (!%p3361_p5), %v3922_v2 }
 0x12d   : > { %s4972_s7 = scalar_lea.vmem %s5483_s1, %s3360_s2  ;;  %3570 = vmatprep.subr.bf16.mxu0 (!%p3361_p5), %v4411_v1 }
 0x12f   : > { %v1054_v9 = vld [vmem:[%s5487_s10] sm:$0xff]  ;;  %v1055_v13 = vld [vmem:[%s5487_s10 + $0x8] sm:$0xff] }
 0x130   : > { %3571 = vmatpush3.bf16.msra.mxu0 %v3923_v3 }
 0x133   : > { %3573 = vmatmul.mubr.msk.bf16.vlgmr.msra.gmra.mrb[0].mxu0 %vm1009_vm1, %v977_v6 }
 0x206   : > { %v1047_v8 = vpop.f32.mrb[0].mxu0 }
 0x207   : > { %v1048_v10 = vadd.f32 %v3362_v7, %v1047_v8  ;;  %v3574_v11 = vpop.f32.mrb[1].mxu0 }
 0x208   : > { %v1050_v12 = vpop.f32.mrb[2].mxu0 }
 0x209   : > { %v1056_v14 = vadd.f32 %v1054_v9, %v1048_v10  ;;  %v1051_v15 = vadd.f32 %v3362_v7, %v1050_v12  ;;  %v3575_v16 = vpop.f32.mrb[3].mxu0 }
 0x20b   : > { %1058 = vst [vmem:[#allocation2] sm:$0xff] %v1056_v14  ;;  %v1057_v17 = vadd.f32 %v1055_v13, %v1051_v15 }
 0x20d   : > { %1059 = vst [vmem:[#allocation2 + $0x8] sm:$0xff] %v1057_v17 }
 0x20e PF: > { %v3924_v28 = vld [vmem:[%s4920_s20] sm:$0xff]   ;;  %v3925_v29 = vld [vmem:[%s4920_s20 + $0x10] sm:$0xff]   ;;  %v4413_v30 = vmov 0.0   ;;  %v3926_v31 = vld [vmem:[%s4920_s20 + $0x8] sm:$0xff]   ;;  %vm4414_vm2 = vmmov 0   ;;  %vm1804_vm3 = vcmask 261120  }
 0x20f   : > { %3576 = vmatprep.subr.bf16.mxu0 %v4413_v30  ;;  %3584 = vmatprep.subr.bf16.mxu1 %v4413_v30  ;;  %v3927_v32 = vld [vmem:[%s4920_s20 + $0x18] sm:$0xff]   ;;  %v3367_v41 = vld [vmem:[%s953_s29] ss:$0 sm:$0xff]  ;;  %v3928_v49 = vld [vmem:[%s4920_s20 + $0x20] sm:$0xff]   ;;  %vm1993_vm4 = vcmask 130048  }
 0x210   : > { %3577 = vmatpush3.bf16.xpose.msra.mxu0 %v3924_v28  ;;  %3585 = vmatpush3.bf16.xpose.msra.mxu1 %v3925_v29  ;;  %v3368_v45 = vld [vmem:[%s956_s19] ss:$0 sm:$0xff]  ;;  %v3929_v50 = vld [vmem:[%s4920_s20 + $0x30] sm:$0xff]   ;;  %v3931_v53 = vld [vmem:[%s4920_s20 + $0x38] sm:$0xff]  }
 0x211   : > { %3578 = vmatprep.subr.bf16.mxu0 %v4413_v30  ;;  %3586 = vmatprep.subr.bf16.mxu1 %v4413_v30  ;;  %v3930_v52 = vld [vmem:[%s4920_s20 + $0x28] sm:$0xff]   ;;  %v3932_v54 = vld [vmem:[%s4926_s5] sm:$0xff]   ;;  %v3933_v55 = vld [vmem:[%s4926_s5 + $0x10] sm:$0xff]   ;;  %s5490_s20 = sld [smem:[#allocation36_spill]] }
 0x212   : > { %v1060_v18 = vld [vmem:[#allocation2] sm:$0xff]  ;;  %3580 = vmatprep.mubr.msk.bf16.mxu0 %vm4414_vm2, %v4413_v30  ;;  %3588 = vmatprep.mubr.msk.bf16.mxu1 %vm4414_vm2, %v4413_v30  ;;  %v3935_v57 = vld [vmem:[%s4926_s5 + $0x18] sm:$0xff]   ;;  %v3936_v58 = vld [vmem:[%s4926_s5 + $0x20] sm:$0xff]  }
 0x213   : > { %1064 = vadd.xlane.f32.xlu0 %v1060_v18  ;;  %v3934_v56 = vld [vmem:[%s4926_s5 + $0x8] sm:$0xff]   ;;  %v3937_v59 = vld [vmem:[%s4926_s5 + $0x30] sm:$0xff]   ;;  %v3939_v61 = vld [vmem:[%s4926_s5 + $0x38] sm:$0xff]  }
 0x214   : > { %v1061_v19 = vld [vmem:[#allocation2 + $0x8] sm:$0xff]  ;;  %v3938_v60 = vld [vmem:[%s4926_s5 + $0x28] sm:$0xff]   ;;  %v3940_v62 = vld [vmem:[%s4928_s30] sm:$0xff]  }
 0x215   : > { %v3941_v63 = vld [vmem:[%s4928_s30 + $0x10] sm:$0xff]   ;;  %v3942_v0 = vld [vmem:[%s4928_s30 + $0x8] sm:$0xff]   ;;  %v3943_v1 = vld [vmem:[%s4928_s30 + $0x18] sm:$0xff]  }
 0x216   : > { %v3944_v2 = vld [vmem:[%s4928_s30 + $0x20] sm:$0xff]   ;;  %v3945_v3 = vld [vmem:[%s4928_s30 + $0x30] sm:$0xff]   ;;  %v3946_v4 = vld [vmem:[%s4928_s30 + $0x28] sm:$0xff]  }
 0x217   : > { %1066 = vadd.xlane.f32.xlu0 %v1061_v19  ;;  %v3947_v5 = vld [vmem:[%s4928_s30 + $0x38] sm:$0xff]  }
 0x218   : > { %3579 = vmatpush3.bf16.xpose.msra.mxu0 %v3926_v31  ;;  %3587 = vmatpush3.bf16.xpose.msra.mxu1 %v3927_v32 }
 0x219   : > { %3592 = vmatprep.subr.bf16.mxu0 %v4413_v30  ;;  %3600 = vmatprep.subr.bf16.mxu1 %v4413_v30 }
 0x2a0   : > { %v1065_v20 = vpop.xlane.xlu0 %1064 }
 0x2a1   : > { %v1069_v21 = vmul.f32 0.0078125, %v1065_v20 }
 0x2a3   : > { %v1071_v22 = vsub.f32 %v1060_v18, %v1069_v21 }
 0x2a4   : > { %v1067_v23 = vpop.xlane.xlu0 %1066 }
 0x2a5   : > { %v1070_v24 = vmul.f32 0.0078125, %v1067_v23  ;;  %v1073_v25 = vmul.f32 %v1071_v22, %v1071_v22 }
 0x2a7   : > { %v1072_v26 = vsub.f32 %v1061_v19, %v1070_v24  ;;  %1075 = vadd.xlane.f32.xlu1 %v1073_v25 }
 0x2a9   : > { %v1074_v27 = vmul.f32 %v1072_v26, %v1072_v26 }
 0x2ab   : > { %1077 = vadd.xlane.f32.xlu1 %v1074_v27 }
 0x334   : > { %v1076_v33 = vpop.xlane.xlu1 %1075 }
 0x335   : > { %v1079_v34 = vmul.f32 0.0078125, %v1076_v33 }
 0x337   : > { %v1081_v35 = vadd.f32 1e-05, %v1079_v34 }
 0x338   : > { %v1078_v36 = vpop.xlane.xlu1 %1077 }
 0x339   : > { %3996 = vrsqrt.f32 %v1081_v35  ;;  %v1080_v37 = vmul.f32 0.0078125, %v1078_v36 }
 0x33b   : > { %v1082_v38 = vadd.f32 1e-05, %v1080_v37 }
 0x33d   : > { %3998 = vrsqrt.f32 %v1082_v38 }
 0x343   : > { %v3997_v39 = vpop.eup %3996 }
 0x344   : > { %v1085_v40 = vmul.f32 %v3997_v39, %v1071_v22 }
 0x346   : > { %v1093_v43 = vmul.f32 %v3367_v41, %v1085_v40 }
 0x347   : > { %v3999_v42 = vpop.eup %3998 }
 0x348   : > { %v1086_v44 = vmul.f32 %v3999_v42, %v1072_v26  ;;  %v1101_v47 = vadd.f32 %v3368_v45, %v1093_v43 }
 0x34a   : > { %v1094_v46 = vmul.f32 %v3367_v41, %v1086_v44 }
 0x34c   : > { %v1102_v48 = vadd.f32 %v3368_v45, %v1094_v46 }
 0x34e   : > { %v5026_v51 = vpack.c.bf16 %v1102_v48, %v1101_v47 }
 0x350   : > { %3581 = vmatmul.mubr.bf16.vlgmr.msra.gmra.mrb[0].mxu0 %v5026_v51  ;;  %3589 = vmatmul.mubr.bf16.vlgmr.msra.gmra.mrb[0].mxu1 %v5026_v51 }
 0x351   : > { %3593 = vmatpush3.bf16.xpose.msra.mxu0 %v3928_v49  ;;  %3601 = vmatpush3.bf16.xpose.msra.mxu1 %v3929_v50 }
 0x352   : > { %3594 = vmatprep.subr.bf16.mxu0 %v4413_v30  ;;  %3602 = vmatprep.subr.bf16.mxu1 %v4413_v30 }
 0x353   : > { %3596 = vmatprep.mubr.msk.bf16.mxu0 %vm4414_vm2, %v4413_v30  ;;  %3604 = vmatprep.mubr.msk.bf16.mxu1 %vm4414_vm2, %v4413_v30 }
 0x359   : > { %3595 = vmatpush3.bf16.xpose.msra.mxu0 %v3930_v52  ;;  %3603 = vmatpush3.bf16.xpose.msra.mxu1 %v3931_v53 }
 0x35a   : > { %3608 = vmatprep.subr.bf16.mxu0 %v4413_v30  ;;  %3616 = vmatprep.subr.bf16.mxu1 %v4413_v30 }
 0x360   : > { %3597 = vmatmul.mubr.bf16.vlgmr.msra.gmra.mrb[4].mxu0 %v5026_v51  ;;  %3605 = vmatmul.mubr.bf16.vlgmr.msra.gmra.mrb[4].mxu1 %v5026_v51 }
 0x361   : > { %3609 = vmatpush3.bf16.xpose.msra.mxu0 %v3932_v54  ;;  %3617 = vmatpush3.bf16.xpose.msra.mxu1 %v3933_v55 }
 0x362   : > { %3610 = vmatprep.subr.bf16.mxu0 %v4413_v30  ;;  %3618 = vmatprep.subr.bf16.mxu1 %v4413_v30 }
 0x363   : > { %3612 = vmatprep.mubr.msk.bf16.mxu0 %vm4414_vm2, %v4413_v30  ;;  %3620 = vmatprep.mubr.msk.bf16.mxu1 %vm4414_vm2, %v4413_v30 }
 0x369   : > { %3611 = vmatpush3.bf16.xpose.msra.mxu0 %v3934_v56  ;;  %3619 = vmatpush3.bf16.xpose.msra.mxu1 %v3935_v57 }
 0x36a   : > { %3624 = vmatprep.subr.bf16.mxu0 %v4413_v30  ;;  %3632 = vmatprep.subr.bf16.mxu1 %v4413_v30 }
 0x370   : > { %3613 = vmatmul.mubr.bf16.vlgmr.msra.gmra.mrb[8].mxu0 %v5026_v51  ;;  %3621 = vmatmul.mubr.bf16.vlgmr.msra.gmra.mrb[8].mxu1 %v5026_v51 }
 0x371   : > { %3625 = vmatpush3.bf16.xpose.msra.mxu0 %v3936_v58  ;;  %3633 = vmatpush3.bf16.xpose.msra.mxu1 %v3937_v59 }
 0x372   : > { %3626 = vmatprep.subr.bf16.mxu0 %v4413_v30  ;;  %3634 = vmatprep.subr.bf16.mxu1 %v4413_v30 }
 0x373   : > { %3628 = vmatprep.mubr.msk.bf16.mxu0 %vm4414_vm2, %v4413_v30  ;;  %3636 = vmatprep.mubr.msk.bf16.mxu1 %vm4414_vm2, %v4413_v30 }
 0x379   : > { %3627 = vmatpush3.bf16.xpose.msra.mxu0 %v3938_v60  ;;  %3635 = vmatpush3.bf16.xpose.msra.mxu1 %v3939_v61 }
 0x37a   : > { %3640 = vmatprep.subr.bf16.mxu0 %v4413_v30  ;;  %3648 = vmatprep.subr.bf16.mxu1 %v4413_v30 }
 0x380   : > { %3629 = vmatmul.mubr.bf16.vlgmr.msra.gmra.mrb[12].mxu0 %v5026_v51  ;;  %3637 = vmatmul.mubr.bf16.vlgmr.msra.gmra.mrb[12].mxu1 %v5026_v51 }
 0x381   : > { %3641 = vmatpush3.bf16.xpose.msra.mxu0 %v3940_v62  ;;  %3649 = vmatpush3.bf16.xpose.msra.mxu1 %v3941_v63 }
 0x382   : > { %3642 = vmatprep.subr.bf16.mxu0 %v4413_v30  ;;  %3650 = vmatprep.subr.bf16.mxu1 %v4413_v30 }
 0x383   : > { %3644 = vmatprep.mubr.msk.bf16.mxu0 %vm4414_vm2, %v4413_v30  ;;  %3652 = vmatprep.mubr.msk.bf16.mxu1 %vm4414_vm2, %v4413_v30 }
 0x389   : > { %3643 = vmatpush3.bf16.xpose.msra.mxu0 %v3942_v0  ;;  %3651 = vmatpush3.bf16.xpose.msra.mxu1 %v3943_v1 }
 0x38a   : > { %3656 = vmatprep.subr.bf16.mxu0 %v4413_v30  ;;  %3664 = vmatprep.subr.bf16.mxu1 %v4413_v30 }
 0x390   : > { %3645 = vmatmul.mubr.bf16.vlgmr.msra.gmra.mrb[16].mxu0 %v5026_v51  ;;  %3653 = vmatmul.mubr.bf16.vlgmr.msra.gmra.mrb[16].mxu1 %v5026_v51 }
 0x391   : > { %3657 = vmatpush3.bf16.xpose.msra.mxu0 %v3944_v2  ;;  %3665 = vmatpush3.bf16.xpose.msra.mxu1 %v3945_v3 }
 0x392   : > { %3658 = vmatprep.subr.bf16.mxu0 %v4413_v30  ;;  %3666 = vmatprep.subr.bf16.mxu1 %v4413_v30 }
 0x393   : > { %3660 = vmatprep.mubr.msk.bf16.mxu0 %vm4414_vm2, %v4413_v30  ;;  %3668 = vmatprep.mubr.msk.bf16.mxu1 %vm4414_vm2, %v4413_v30 }
 0x399   : > { %3659 = vmatpush3.bf16.xpose.msra.mxu0 %v3946_v4  ;;  %3667 = vmatpush3.bf16.xpose.msra.mxu1 %v3947_v5 }
 0x39a   : > { %3672 = vmatprep.subr.bf16.mxu0 %v4413_v30  ;;  %3678 = vmatprep.subr.bf16.mxu1 %v4413_v30 }
 0x3a0   : > { %3661 = vmatmul.mubr.bf16.vlgmr.msra.gmra.mrb[20].mxu0 %v5026_v51  ;;  %3669 = vmatmul.mubr.bf16.vlgmr.msra.gmra.mrb[20].mxu1 %v5026_v51 }
 0x3a1   : > { %3674 = vmatprep.mubr.msk.bf16.mxu0 %vm4414_vm2, %v4413_v30  ;;  %3680 = vmatprep.mubr.msk.bf16.mxu1 %vm4414_vm2, %v4413_v30 }
 0x423   : > { %v1166_v6 = vpop.f32.mrb[0].mxu0  ;;  %v1219_v7 = vpop.f32.mrb[0].mxu1 }
 0x424   : > { %v3582_v8 = vpop.f32.mrb[1].mxu0  ;;  %v3590_v9 = vpop.f32.mrb[1].mxu1  ;;  %v1332_v10 = vmul.f32 0.17677669, %v1166_v6  ;;  %v1334_v11 = vmul.f32 0.17677669, %v1219_v7 }
 0x425   : > { %v1169_v12 = vpop.f32.mrb[2].mxu0  ;;  %v1222_v13 = vpop.f32.mrb[2].mxu1 }
 0x426   : > { %v1333_v14 = vmul.f32 0.17677669, %v1169_v12  ;;  %v1335_v15 = vmul.f32 0.17677669, %v1222_v13  ;;  %v3583_v16 = vpop.f32.mrb[3].mxu0  ;;  %v3591_v17 = vpop.f32.mrb[3].mxu1 }
 0x428   : > { %v1796_v18 = vpack.c.bf16 %v1333_v14, %v1332_v10  ;;  %v1797_v19 = vpack.c.bf16 %v1335_v15, %v1334_v11 }
 0x433   : > { %v1272_v20 = vpop.f32.mrb[4].mxu0  ;;  %v1325_v21 = vpop.f32.mrb[4].mxu1 }
 0x434   : > { %v3598_v22 = vpop.f32.mrb[5].mxu0  ;;  %v3606_v23 = vpop.f32.mrb[5].mxu1  ;;  %v1336_v24 = vmul.f32 0.17677669, %v1272_v20  ;;  %v1338_v25 = vmul.f32 0.17677669, %v1325_v21 }
 0x435   : > { %v1275_v26 = vpop.f32.mrb[6].mxu0  ;;  %v1328_v27 = vpop.f32.mrb[6].mxu1 }
 0x436   : > { %v1337_v28 = vmul.f32 0.17677669, %v1275_v26  ;;  %v1339_v29 = vmul.f32 0.17677669, %v1328_v27  ;;  %v3599_v31 = vpop.f32.mrb[7].mxu0  ;;  %v3607_v32 = vpop.f32.mrb[7].mxu1 }
 0x438   : > { %v1798_v33 = vpack.c.bf16 %v1337_v28, %v1336_v24  ;;  %v1799_v34 = vpack.c.bf16 %v1339_v29, %v1338_v25 }
 0x443   : > { %v1402_v35 = vpop.f32.mrb[8].mxu0  ;;  %v1455_v36 = vpop.f32.mrb[8].mxu1 }
 0x444   : > { %v3614_v37 = vpop.f32.mrb[9].mxu0  ;;  %v3622_v38 = vpop.f32.mrb[9].mxu1 }
 0x445   : > { %v1405_v39 = vpop.f32.mrb[10].mxu0  ;;  %v1458_v40 = vpop.f32.mrb[10].mxu1 }
 0x446   : > { %v1800_v41 = vpack.c.bf16 %v1405_v39, %v1402_v35  ;;  %v1801_v42 = vpack.c.bf16 %v1458_v40, %v1455_v36  ;;  %v3615_v43 = vpop.f32.mrb[11].mxu0  ;;  %v3623_v44 = vpop.f32.mrb[11].mxu1 }
 0x448   : > { %v1809_v45 = vsel %vm1804_vm3, %v1800_v41, 0  ;;  %v1856_v46 = vsel %vm1804_vm3, %v1801_v42, 0 }
 0x449   : > { %3673 = vmatpush3.bf16.xpose.msra.mxu0 %v1809_v45  ;;  %3679 = vmatpush3.bf16.xpose.msra.mxu1 %v1856_v46 }
 0x44a   : > { %3684 = vmatprep.subr.bf16.mxu0 %v4413_v30  ;;  %3690 = vmatprep.subr.bf16.mxu1 %v4413_v30 }
 0x450   : > { %3675 = vmatmul.mubr.msk.bf16.vlgmr.msra.gmra.mrb[24].mxu0 %vm1804_vm3, %v1796_v18  ;;  %3681 = vmatmul.mubr.msk.bf16.vlgmr.msra.gmra.mrb[24].mxu1 %vm1804_vm3, %v1797_v19 }
 0x451   : > { %3686 = vmatprep.mubr.msk.bf16.mxu0 %vm4414_vm2, %v4413_v30  ;;  %3692 = vmatprep.mubr.msk.bf16.mxu1 %vm4414_vm2, %v4413_v30 }
 0x453   : > { %v1508_v47 = vpop.f32.mrb[12].mxu0  ;;  %v1561_v48 = vpop.f32.mrb[12].mxu1 }
 0x454   : > { %v3630_v49 = vpop.f32.mrb[13].mxu0  ;;  %v3638_v50 = vpop.f32.mrb[13].mxu1 }
 0x455   : > { %v1511_v51 = vpop.f32.mrb[14].mxu0  ;;  %v1564_v52 = vpop.f32.mrb[14].mxu1 }
 0x456   : > { %v1802_v53 = vpack.c.bf16 %v1511_v51, %v1508_v47  ;;  %v1803_v54 = vpack.c.bf16 %v1564_v52, %v1561_v48  ;;  %v3631_v55 = vpop.f32.mrb[15].mxu0  ;;  %v3639_v56 = vpop.f32.mrb[15].mxu1 }
 0x458   : > { %v1903_v57 = vsel %vm1804_vm3, %v1802_v53, 0  ;;  %v1950_v58 = vsel %vm1804_vm3, %v1803_v54, 0 }
 0x459   : > { %3685 = vmatpush3.bf16.xpose.msra.mxu0 %v1903_v57  ;;  %3691 = vmatpush3.bf16.xpose.msra.mxu1 %v1950_v58 }
 0x45a   : > { %3696 = vmatprep.subr.bf16.mxu0 %v4413_v30  ;;  %3702 = vmatprep.subr.bf16.mxu1 %v4413_v30 }
 0x460   : > { %3687 = vmatmul.mubr.msk.bf16.vlgmr.msra.gmra.mrb[28].mxu0 %vm1804_vm3, %v1798_v33  ;;  %3693 = vmatmul.mubr.msk.bf16.vlgmr.msra.gmra.mrb[28].mxu1 %vm1804_vm3, %v1799_v34 }
 0x461   : > { %3698 = vmatprep.mubr.msk.bf16.mxu0 %vm4414_vm2, %v4413_v30  ;;  %3704 = vmatprep.mubr.msk.bf16.mxu1 %vm4414_vm2, %v4413_v30 }
 0x463   : > { %v1630_v59 = vpop.f32.mrb[16].mxu0  ;;  %v1683_v60 = vpop.f32.mrb[16].mxu1 }
 0x464   : > { %v3646_v61 = vpop.f32.mrb[17].mxu0  ;;  %v3654_v62 = vpop.f32.mrb[17].mxu1 }
 0x465   : > { %v1633_v63 = vpop.f32.mrb[18].mxu0  ;;  %v1686_v0 = vpop.f32.mrb[18].mxu1 }
 0x466   : > { %v2086_v1 = vpack.c.bf16 %v1633_v63, %v1630_v59  ;;  %v2087_v2 = vpack.c.bf16 %v1686_v0, %v1683_v60  ;;  %v3647_v3 = vpop.f32.mrb[19].mxu0  ;;  %v3655_v4 = vpop.f32.mrb[19].mxu1 }
 0x468   : > { %3697 = vmatpush3.bf16.msra.mxu0 %v2086_v1  ;;  %3703 = vmatpush3.bf16.msra.mxu1 %v2087_v2 }
 0x469   : > { %3708 = vmatprep.subr.bf16.mxu0 %v4413_v30  ;;  %3714 = vmatprep.subr.bf16.mxu1 %v4413_v30 }
 0x473   : > { %v5124_v5 = vpop.f32.mrb[20].mxu0  ;;  %v5126_v6 = vpop.f32.mrb[20].mxu1 }
 0x474   : > { %v3662_v7 = vpop.f32.mrb[21].mxu0  ;;  %v3670_v8 = vpop.f32.mrb[21].mxu1 }
 0x475   : > { %v5128_v9 = vpop.f32.mrb[22].mxu0  ;;  %v5130_v10 = vpop.f32.mrb[22].mxu1 }
 0x476   : > { %v2088_v11 = vpack.c.bf16 %v5128_v9, %v5124_v5  ;;  %v2089_v12 = vpack.c.bf16 %v5130_v10, %v5126_v6  ;;  %v3663_v13 = vpop.f32.mrb[23].mxu0  ;;  %v3671_v14 = vpop.f32.mrb[23].mxu1 }
 0x523   : > { %v1845_v15 = vpop.f32.mrb[24].mxu0  ;;  %v1892_v16 = vpop.f32.mrb[24].mxu1 }
 0x524   : > { %v3676_v17 = vpop.f32.mrb[25].mxu0  ;;  %v3682_v18 = vpop.f32.mrb[25].mxu1  ;;  %v1994_v19 = vsel %vm1993_vm4, %v1845_v15, -inf  ;;  %v2000_v25 = vsel %vm1993_vm4, %v1892_v16, -inf }
 0x525   : > { %v1895_v20 = vpop.f32.mrb[26].mxu1  ;;  %1995 = vmax.xlane.f32.xlu0 %v1994_v19  ;;  %v1848_v21 = vpop.f32.mrb[26].mxu0 }
 0x526   : > { %v3677_v22 = vpop.f32.mrb[27].mxu0  ;;  %v3683_v23 = vpop.f32.mrb[27].mxu1  ;;  %v1997_v24 = vsel %vm1993_vm4, %v1848_v21, -inf  ;;  %v2003_v26 = vsel %vm1993_vm4, %v1895_v20, -inf }
 0x527   : > { %1998 = vmax.xlane.f32.xlu1 %v1997_v24 }
 0x529   : > { %2001 = vmax.xlane.f32.xlu0 %v2000_v25 }
 0x52b   : > { %2004 = vmax.xlane.f32.xlu1 %v2003_v26 }
 0x533   : > { %v1939_v27 = vpop.f32.mrb[28].mxu0  ;;  %v1986_v28 = vpop.f32.mrb[28].mxu1 }
 0x534   : > { %v3688_v29 = vpop.f32.mrb[29].mxu0  ;;  %v3694_v31 = vpop.f32.mrb[29].mxu1  ;;  %v2006_v32 = vsel %vm1993_vm4, %v1939_v27, -inf  ;;  %v2012_v38 = vsel %vm1993_vm4, %v1986_v28, -inf }
 0x535   : > { %v1989_v33 = vpop.f32.mrb[30].mxu1  ;;  %2007 = vmax.xlane.f32.xlu0 %v2006_v32  ;;  %v1942_v34 = vpop.f32.mrb[30].mxu0 }
 0x536   : > { %v3689_v35 = vpop.f32.mrb[31].mxu0  ;;  %v3695_v36 = vpop.f32.mrb[31].mxu1  ;;  %v2009_v37 = vsel %vm1993_vm4, %v1942_v34, -inf  ;;  %v2015_v39 = vsel %vm1993_vm4, %v1989_v33, -inf }
 0x537   : > { %2010 = vmax.xlane.f32.xlu1 %v2009_v37 }
 0x539   : > { %2013 = vmax.xlane.f32.xlu0 %v2012_v38 }
 0x53b   : > { %2016 = vmax.xlane.f32.xlu1 %v2015_v39 }
 0x5b2   : > { %v1996_v40 = vpop.xlane.xlu0 %1995 }
 0x5b3   : > { %v2018_v41 = vsub.f32 %v1845_v15, %v1996_v40 }
 0x5b4   : > { %v1999_v42 = vpop.xlane.xlu1 %1998 }
 0x5b5   : > { %v2026_v43 = vmul.f32 1.442695, %v2018_v41  ;;  %v2019_v44 = vsub.f32 %v1848_v21, %v1999_v42 }
 0x5b6   : > { %v2002_v45 = vpop.xlane.xlu0 %2001 }
 0x5b7   : > { %4000 = vpow2.f32 %v2026_v43  ;;  %v2028_v46 = vmul.f32 1.442695, %v2019_v44  ;;  %v2020_v47 = vsub.f32 %v1892_v16, %v2002_v45  ;;  %v3948_v43 = vld [vmem:[%s4934_s27] sm:$0xff]  }
 0x5b8   : > { %v2005_v48 = vpop.xlane.xlu1 %2004 }
 0x5b9   : > { %4002 = vpow2.f32 %v2028_v46  ;;  %v2030_v49 = vmul.f32 1.442695, %v2020_v47  ;;  %v2021_v50 = vsub.f32 %v1895_v20, %v2005_v48  ;;  %v3950_v47 = vld [vmem:[%s4934_s27 + $0x10] sm:$0xff]   ;;  %v3951_v48 = vld [vmem:[%s4934_s27 + $0x18] sm:$0xff]  }
 0x5bb   : > { %4004 = vpow2.f32 %v2030_v49  ;;  %v2032_v51 = vmul.f32 1.442695, %v2021_v50 }
 0x5bd   : > { %4006 = vpow2.f32 %v2032_v51 }
 0x5c1   : > { %v4001_v52 = vpop.eup %4000 }
 0x5c2   : > { %v2008_v53 = vpop.xlane.xlu0 %2007  ;;  %v2042_v54 = vsel %vm1993_vm4, %v4001_v52, 0.0 }
 0x5c3   : > { %v4003_v55 = vpop.eup %4002  ;;  %v2022_v56 = vsub.f32 %v1939_v27, %v2008_v53  ;;  %2043 = vadd.xlane.f32.xlu0 %v2042_v54 }
 0x5c4   : > { %v2011_v57 = vpop.xlane.xlu1 %2010  ;;  %v2045_v58 = vsel %vm1993_vm4, %v4003_v55, 0.0 }
 0x5c5   : > { %v4005_v59 = vpop.eup %4004  ;;  %v2034_v60 = vmul.f32 1.442695, %v2022_v56  ;;  %v2023_v61 = vsub.f32 %v1942_v34, %v2011_v57  ;;  %2046 = vadd.xlane.f32.xlu1 %v2045_v58  ;;  %v3953_v58 = vld [vmem:[%s4934_s27 + $0x28] sm:$0xff]  }
 0x5c6   : > { %v2014_v62 = vpop.xlane.xlu0 %2013  ;;  %v2048_v63 = vsel %vm1993_vm4, %v4005_v59, 0.0 }
 0x5c7   : > { %v4007_v0 = vpop.eup %4006  ;;  %4008 = vpow2.f32 %v2034_v60  ;;  %v2036_v1 = vmul.f32 1.442695, %v2023_v61  ;;  %v2024_v2 = vsub.f32 %v1986_v28, %v2014_v62  ;;  %2049 = vadd.xlane.f32.xlu0 %v2048_v63  ;;  %v3955_v62 = vld [vmem:[%s4934_s27 + $0x38] sm:$0xff]  }
 0x5c8   : > { %v2017_v3 = vpop.xlane.xlu1 %2016  ;;  %v2051_v4 = vsel %vm1993_vm4, %v4007_v0, 0.0 }
 0x5c9   : > { %4010 = vpow2.f32 %v2036_v1  ;;  %v2038_v7 = vmul.f32 1.442695, %v2024_v2  ;;  %v2025_v8 = vsub.f32 %v1989_v33, %v2017_v3  ;;  %2052 = vadd.xlane.f32.xlu1 %v2051_v4 }
 0x5cb   : > { %4012 = vpow2.f32 %v2038_v7  ;;  %v2040_v13 = vmul.f32 1.442695, %v2025_v8 }
 0x5cd   : > { %4014 = vpow2.f32 %v2040_v13 }
 0x5d1   : > { %v4009_v14 = vpop.eup %4008 }
 0x5d2   : > { %v2054_v15 = vsel %vm1993_vm4, %v4009_v14, 0.0 }
 0x5d3   : > { %v4011_v16 = vpop.eup %4010  ;;  %2055 = vadd.xlane.f32.xlu0 %v2054_v15 }
 0x5d4   : > { %v2057_v17 = vsel %vm1993_vm4, %v4011_v16, 0.0 }
 0x5d5   : > { %v4013_v18 = vpop.eup %4012  ;;  %2058 = vadd.xlane.f32.xlu1 %v2057_v17 }
 0x5d6   : > { %v2060_v19 = vsel %vm1993_vm4, %v4013_v18, 0.0 }
 0x5d7   : > { %v4015_v20 = vpop.eup %4014  ;;  %2061 = vadd.xlane.f32.xlu0 %v2060_v19 }
 0x5d8   : > { %v2063_v21 = vsel %vm1993_vm4, %v4015_v20, 0.0 }
 0x5d9   : > { %2064 = vadd.xlane.f32.xlu1 %v2063_v21 }
 0x650   : > { %v2044_v22 = vpop.xlane.xlu0 %2043 }
 0x651   : > { %4016 = vrcp.f32 %v2044_v22 }
 0x652   : > { %v2047_v23 = vpop.xlane.xlu1 %2046 }
 0x653   : > { %4018 = vrcp.f32 %v2047_v23 }
 0x654   : > { %v2050_v24 = vpop.xlane.xlu0 %2049 }
 0x655   : > { %4020 = vrcp.f32 %v2050_v24 }
 0x656   : > { %v2053_v25 = vpop.xlane.xlu1 %2052 }
 0x657   : > { %4022 = vrcp.f32 %v2053_v25 }
 0x65b   : > { %v4017_v26 = vpop.eup %4016 }
 0x65c   : > { %v2074_v28 = vmul.f32 %v4017_v26, %v4001_v52  ;;  %v3952_v52 = vld [vmem:[%s4934_s27 + $0x20] sm:$0xff]  }
 0x65d   : > { %v4019_v27 = vpop.eup %4018 }
 0x65e   : > { %v2075_v29 = vmul.f32 %v4019_v27, %v4003_v55 }
 0x65f   : > { %v4021_v31 = vpop.eup %4020 }
 0x660   : > { %v2056_v32 = vpop.xlane.xlu0 %2055  ;;  %v2082_v33 = vpack.c.bf16 %v2075_v29, %v2074_v28  ;;  %v2076_v35 = vmul.f32 %v4021_v31, %v4005_v59  ;;  %v3954_v59 = vld [vmem:[%s4934_s27 + $0x30] sm:$0xff]  }
 0x661   : > { %v4023_v34 = vpop.eup %4022  ;;  %4024 = vrcp.f32 %v2056_v32 }
 0x662   : > { %v2077_v36 = vmul.f32 %v4023_v34, %v4007_v0  ;;  %3699 = vmatmul.mubr.msk.bf16.vlgmr.msra.gmra.mrb[32].mxu0 %vm1993_vm4, %v2082_v33  ;;  %v2059_v37 = vpop.xlane.xlu1 %2058 }
 0x663   : > { %3709 = vmatpush3.bf16.msra.mxu0 %v2088_v11  ;;  %4026 = vrcp.f32 %v2059_v37  ;;  %3710 = vmatprep.mubr.msk.bf16.mxu0 %vm4414_vm2, %v4413_v30 }
 0x664   : > { %v2062_v38 = vpop.xlane.xlu0 %2061  ;;  %v2083_v39 = vpack.c.bf16 %v2077_v36, %v2076_v35  ;;  %3720 = vmatprep.subr.bf16.mxu0 %v4413_v30  ;;  %v4044_v35 = vld [vmem:[#allocation2] sm:$0xff] }
 0x665   : > { %4028 = vrcp.f32 %v2062_v38 }
 0x666   : > { %3705 = vmatmul.mubr.msk.bf16.vlgmr.msra.gmra.mrb[32].mxu1 %vm1993_vm4, %v2083_v39  ;;  %v2065_v40 = vpop.xlane.xlu1 %2064  ;;  %v4045_v39 = vld [vmem:[#allocation2 + $0x8] sm:$0xff] }
 0x667   : > { %3715 = vmatpush3.bf16.msra.mxu1 %v2089_v12  ;;  %4030 = vrcp.f32 %v2065_v40  ;;  %3716 = vmatprep.mubr.msk.bf16.mxu1 %vm4414_vm2, %v4413_v30  ;;  %v3949_v12 = vld [vmem:[%s4934_s27 + $0x8] sm:$0xff]  }
 0x668   : > { %3728 = vmatprep.subr.bf16.mxu1 %v4413_v30 }
 0x66b   : > { %v4025_v5 = vpop.eup %4024 }
 0x66c   : > { %v2078_v11 = vmul.f32 %v4025_v5, %v4009_v14  ;;  %v3956_v5 = vld [vmem:[%s5490_s20] ss:$8 sps:$4 sm:$0xff]  }
 0x66d   : > { %v4027_v9 = vpop.eup %4026 }
 0x66e   : > { %v2079_v41 = vmul.f32 %v4027_v9, %v4011_v16  ;;  %v3958_v9 = vld [vmem:[%s5490_s20 + $0x4] ss:$8 sps:$4 sm:$0xff]  }
 0x66f   : > { %v4029_v42 = vpop.eup %4028 }
 0x670   : > { %v2084_v44 = vpack.c.bf16 %v2079_v41, %v2078_v11  ;;  %v2080_v46 = vmul.f32 %v4029_v42, %v4013_v18  ;;  %v3961_v11 = vld [vmem:[%s5490_s20 + $0x14] ss:$8 sps:$4 sm:$0xff]   ;;  %v3959_v41 = vld [vmem:[%s5490_s20 + $0x10] ss:$8 sps:$4 sm:$0xff]  }
 0x671   : > { %v4031_v45 = vpop.eup %4030 }
 0x672   : > { %v2081_v6 = vmul.f32 %v4031_v45, %v4015_v20  ;;  %3711 = vmatmul.mubr.msk.bf16.vlgmr.msra.gmra.mrb[36].mxu0 %vm1993_vm4, %v2084_v44 }
 0x673   : > { %3721 = vmatpush3.bf16.msra.mxu0 %v3948_v43  ;;  %3724 = vmatprep.mubr.msk.bf16.mxu0 %vm4414_vm2, %v4413_v30 }
 0x674   : > { %v2085_v10 = vpack.c.bf16 %v2081_v6, %v2080_v46  ;;  %3722 = vmatprep.subr.bf16.mxu0 %v4413_v30 }
 0x676   : > { %3717 = vmatmul.mubr.msk.bf16.vlgmr.msra.gmra.mrb[36].mxu1 %vm1993_vm4, %v2085_v10 }
 0x677   : > { %3732 = vmatprep.mubr.msk.bf16.mxu1 %vm4414_vm2, %v4413_v30  ;;  %3723 = vmatpush3.bf16.msra.mxu0 %v3949_v12 }
 0x678   : > { %3729 = vmatpush3.bf16.msra.mxu1 %v3950_v47  ;;  %3736 = vmatprep.subr.bf16.mxu0 %v4413_v30  ;;  %v3964_v47 = vld [vmem:[%s5490_s20 + $0x24] ss:$8 sps:$4 sm:$0xff]  }
 0x679   : > { %3730 = vmatprep.subr.bf16.mxu1 %v4413_v30 }
 0x67c   : > { %3731 = vmatpush3.bf16.msra.mxu1 %v3951_v48  ;;  %v3962_v48 = vld [vmem:[%s5490_s20 + $0x20] ss:$8 sps:$4 sm:$0xff]  }
 0x67d   : > { %3744 = vmatprep.subr.bf16.mxu1 %v4413_v30 }
 0x735   : > { %v2127_v49 = vpop.f32.mrb[32].mxu0 }
 0x736   : > { %v3700_v50 = vpop.f32.mrb[33].mxu0 }
 0x737   : > { %v2130_v51 = vpop.f32.mrb[34].mxu0  ;;  %v3965_v50 = vld [vmem:[%s5490_s20 + $0x30] ss:$8 sps:$4 sm:$0xff]  }
 0x738   : > { %v2266_v53 = vpack.c.bf16 %v2130_v51, %v2127_v49  ;;  %v3701_v54 = vpop.f32.mrb[35].mxu0  ;;  %v3967_v49 = vld [vmem:[%s5490_s20 + $0x34] ss:$8 sps:$4 sm:$0xff]   ;;  %v3970_v51 = vld [vmem:[%s5490_s20 + $0x44] ss:$8 sps:$4 sm:$0xff]  }
 0x739   : > { %v2171_v55 = vpop.f32.mrb[32].mxu1  ;;  %v3971_v54 = vld [vmem:[%s5490_s20 + $0x50] ss:$8 sps:$4 sm:$0xff]  }
 0x73a   : > { %v3706_v56 = vpop.f32.mrb[33].mxu1  ;;  %3725 = vmatmul.mubr.msk.bf16.vlgmr.msra.gmra.mrb[40].mxu0 %vm1804_vm3, %v2266_v53  ;;  %v3973_v53 = vld [vmem:[%s5490_s20 + $0x54] ss:$8 sps:$4 sm:$0xff]  }
 0x73b   : > { %v2174_v57 = vpop.f32.mrb[34].mxu1  ;;  %3737 = vmatpush3.bf16.msra.mxu0 %v3952_v52  ;;  %3740 = vmatprep.mubr.msk.bf16.mxu0 %vm4414_vm2, %v4413_v30  ;;  %v3968_v52 = vld [vmem:[%s5490_s20 + $0x40] ss:$8 sps:$4 sm:$0xff]  }
 0x73c   : > { %v2267_v60 = vpack.c.bf16 %v2174_v57, %v2171_v55  ;;  %v3707_v61 = vpop.f32.mrb[35].mxu1  ;;  %3738 = vmatprep.subr.bf16.mxu0 %v4413_v30  ;;  %v3976_v55 = vld [vmem:[%s5490_s20 + $0x64] ss:$8 sps:$4 sm:$0xff]   ;;  %v3974_v56 = vld [vmem:[%s5490_s20 + $0x60] ss:$8 sps:$4 sm:$0xff]  }
 0x73d   : > { %v3979_v57 = vld [vmem:[%s5490_s20 + $0x74] ss:$8 sps:$4 sm:$0xff]  }
 0x73e   : > { %3733 = vmatmul.mubr.msk.bf16.vlgmr.msra.gmra.mrb[40].mxu1 %vm1804_vm3, %v2267_v60  ;;  %v3980_v60 = vld [vmem:[%s4978_s9 + $0x40] sm:$0xff]  }
 0x73f   : > { %3739 = vmatpush3.bf16.msra.mxu0 %v3953_v58  ;;  %3745 = vmatpush3.bf16.msra.mxu1 %v3954_v59  ;;  %v3977_v58 = vld [vmem:[%s5490_s20 + $0x70] ss:$8 sps:$4 sm:$0xff]   ;;  %v4415_v59 = vmov 0  }
 0x740   : > { %3746 = vmatprep.subr.bf16.mxu1 %v4413_v30  ;;  %3748 = vmatprep.mubr.msk.bf16.mxu1 %vm4414_vm2, %v4413_v30  ;;  %v3981_v61 = vld [vmem:[%s4978_s9] sm:$0xff]  }
 0x741   : > { %2667 = vmatprep.subr.bf16.mxu0 %v3958_v9 }
 0x743   : > { %3747 = vmatpush3.bf16.msra.mxu1 %v3955_v62  ;;  %v3982_v62 = vld [vmem:[%s4978_s9 + $0x48] sm:$0xff]  }
 0x744   : > { %3535 = vmatprep.subr.bf16.mxu1 %v3980_v60 }
 0x745   : > { %v2215_v63 = vpop.f32.mrb[36].mxu0 }
 0x746   : > { %v3712_v0 = vpop.f32.mrb[37].mxu0 }
 0x747   : > { %v2218_v1 = vpop.f32.mrb[38].mxu0 }
 0x748   : > { %v2268_v2 = vpack.c.bf16 %v2218_v1, %v2215_v63  ;;  %v3713_v3 = vpop.f32.mrb[39].mxu0  ;;  %v3983_v63 = vld [vmem:[%s4978_s9 + $0x8] sm:$0xff]  }
 0x749   : > { %v2259_v4 = vpop.f32.mrb[36].mxu1 }
 0x74a   : > { %v3718_v7 = vpop.f32.mrb[37].mxu1  ;;  %3741 = vmatmul.mubr.msk.bf16.vlgmr.msra.gmra.mrb[44].mxu0 %vm1804_vm3, %v2268_v2 }
 0x74b   : > { %v2262_v8 = vpop.f32.mrb[38].mxu1  ;;  %2668 = vmatpush1.bf16.msra.mxu0 %v3956_v5  ;;  %2699 = vmatprep.mubr.bf16.mxu0 %v4415_v59 }
 0x74c   : > { %v2269_v13 = vpack.c.bf16 %v2262_v8, %v2259_v4  ;;  %v3719_v14 = vpop.f32.mrb[39].mxu1  ;;  %2669 = vmatprep.subr.bf16.mxu0 %v3961_v11 }
 0x74e   : > { %3749 = vmatmul.mubr.msk.bf16.vlgmr.msra.gmra.mrb[44].mxu1 %vm1804_vm3, %v2269_v13  ;;  %v3413_v13 = vld [vmem:[%s959_s11] ss:$0 sm:$0xff] }
 0x74f   : > { %2670 = vmatpush1.bf16.msra.mxu0 %v3959_v41  ;;  %3536 = vmatpush3.bf16.msra.mxu1 %v3981_v61 }
 0x750   : > { %2671 = vmatprep.subr.bf16.mxu0 %v3964_v47  ;;  %3537 = vmatprep.subr.bf16.mxu1 %v3982_v62 }
 0x753   : > { %2672 = vmatpush1.bf16.msra.mxu0 %v3962_v48  ;;  %3538 = vmatpush3.bf16.msra.mxu1 %v3983_v63 }
 0x754   : > { %2673 = vmatprep.subr.bf16.mxu0 %v3967_v49 }
 0x757   : > { %2674 = vmatpush1.bf16.msra.mxu0 %v3965_v50 }
 0x758   : > { %2675 = vmatprep.subr.bf16.mxu0 %v3970_v51 }
 0x75b   : > { %2676 = vmatpush1.bf16.msra.mxu0 %v3968_v52 }
 0x75c   : > { %2677 = vmatprep.subr.bf16.mxu0 %v3973_v53 }
 0x75f   : > { %2678 = vmatpush1.bf16.msra.mxu0 %v3971_v54 }
 0x760   : > { %2679 = vmatprep.subr.bf16.mxu0 %v3976_v55 }
 0x763   : > { %2680 = vmatpush1.bf16.msra.mxu0 %v3974_v56 }
 0x764   : > { %2681 = vmatprep.subr.bf16.mxu0 %v3979_v57 }
 0x767   : > { %2682 = vmatpush1.bf16.msra.mxu0 %v3977_v58 }
 0x80d   : > { %v2335_v15 = vpop.f32.mrb[40].mxu0 }
 0x80e   : > { %v3726_v16 = vpop.f32.mrb[41].mxu0 }
 0x80f   : > { %v2338_v17 = vpop.f32.mrb[42].mxu0 }
 0x810   : > { %v3727_v18 = vpop.f32.mrb[43].mxu0 }
 0x811   : > { %v2391_v30 = vpop.f32.mrb[40].mxu1  ;;  %v3414_v18 = vld [vmem:[%s962_s23] ss:$0 sm:$0xff] }
 0x812   : > { %v2510_v19 = vadd.f32 %v2391_v30, %v2335_v15  ;;  %v3734_v20 = vpop.f32.mrb[41].mxu1 }
 0x813   : > { %v2394_v21 = vpop.f32.mrb[42].mxu1 }
 0x814   : > { %v2513_v22 = vadd.f32 %v2394_v21, %v2338_v17  ;;  %v3735_v23 = vpop.f32.mrb[43].mxu1 }
 0x815   : > { %v3985_v23 = vld [vmem:[%s4978_s9 + $0x10] sm:$0xff]  }
 0x81d   : > { %v2447_v24 = vpop.f32.mrb[44].mxu0 }
 0x81e   : > { %v2511_v25 = vadd.f32 %v2510_v19, %v2447_v24  ;;  %v3742_v26 = vpop.f32.mrb[45].mxu0  ;;  %v3986_v24 = vld [vmem:[%s4978_s9 + $0x58] sm:$0xff]  }
 0x81f   : > { %v2450_v27 = vpop.f32.mrb[46].mxu0  ;;  %v3988_v26 = vld [vmem:[%s4978_s9 + $0x60] sm:$0xff]  }
 0x820   : > { %v2514_v28 = vadd.f32 %v2513_v22, %v2450_v27  ;;  %v3743_v29 = vpop.f32.mrb[47].mxu0  ;;  %v3984_v22 = vld [vmem:[%s4978_s9 + $0x50] sm:$0xff]   ;;  %v3989_v27 = vld [vmem:[%s4978_s9 + $0x20] sm:$0xff]  }
 0x821   : > { %v2503_v31 = vpop.f32.mrb[44].mxu1  ;;  %3539 = vmatprep.subr.bf16.mxu1 %v3984_v22  ;;  %v3991_v29 = vld [vmem:[%s4978_s9 + $0x28] sm:$0xff]  }
 0x822   : > { %v2512_v32 = vadd.f32 %v2511_v25, %v2503_v31  ;;  %v3750_v33 = vpop.f32.mrb[45].mxu1  ;;  %3540 = vmatpush3.bf16.msra.mxu1 %v3985_v23  ;;  %v3987_v25 = vld [vmem:[%s4978_s9 + $0x18] sm:$0xff]   ;;  %v3992_v31 = vld [vmem:[%s4978_s9 + $0x70] sm:$0xff]  }
 0x823   : > { %v2506_v34 = vpop.f32.mrb[46].mxu1  ;;  %3541 = vmatprep.subr.bf16.mxu1 %v3986_v24  ;;  %v3994_v33 = vld [vmem:[%s4978_s9 + $0x78] sm:$0xff]  }
 0x824   : > { %v5194_v36 = vadd.f32 %v4044_v35, %v2512_v32  ;;  %v2515_v37 = vadd.f32 %v2514_v28, %v2506_v34  ;;  %v3751_v38 = vpop.f32.mrb[47].mxu1  ;;  %v3990_v28 = vld [vmem:[%s4978_s9 + $0x68] sm:$0xff]   ;;  %v3993_v32 = vld [vmem:[%s4978_s9 + $0x30] sm:$0xff]   ;;  %v3995_v34 = vld [vmem:[%s4978_s9 + $0x38] sm:$0xff]   ;;  %v2577_v35 = vlaneseq  ;;  %s5494_s9 = sld [smem:[#allocation25_spill]] }
 0x826   : > { %v5196_v40 = vadd.f32 %v4045_v39, %v2515_v37  ;;  %2520 = vadd.xlane.f32.xlu0 %v5194_v36  ;;  %3542 = vmatpush3.bf16.msra.mxu1 %v3987_v25  ;;  %v2578_v37 = vshrl.u32 %v2577_v35, 7  ;;  %v2575_v39 = vld [vmem:[%s4972_s7] sm:$0x3] }
 0x827   : > { %3543 = vmatprep.subr.bf16.mxu1 %v3988_v26 }
 0x828   : > { %2522 = vadd.xlane.f32.xlu1 %v5196_v40  ;;  %v2579_v38 = vsub.s32 0, %v2578_v37  ;;  %v2583_v5 = vsub.s32 1, %v2578_v37 }
 0x82a   : > { %3544 = vmatpush3.bf16.msra.mxu1 %v3989_v27  ;;  %v2580_v9 = vrot.slane %v2575_v39, %v2579_v38  ;;  %v2584_v11 = vrot.slane %v2575_v39, %v2583_v5  ;;  %p3448_p12 = scmp.ne.s32.totalorder %s5494_s9, 1 }
 0x82b   : > { %3545 = vmatprep.subr.bf16.mxu1 %v3990_v28  ;;  %s5495_s2 = sld [smem:[#allocation55_spill]] (!%p3448_p12)  ;;  %vm4417_vm5 = vmmov (!%p3448_p12), 0   ;;  %s5497_s29 = sld [smem:[#allocation53_spill]] (!%p3448_p12)  ;;  %vm3048_vm6 = vcmask (!%p3448_p12), 73728  }
 0x82c   : > { %s5498_s11 = sld [smem:[#allocation54_spill]] (!%p3448_p12)  ;;  %s5499_s9 = sld [smem:[#allocation56_spill]] (!%p3448_p12) }
 0x82e   : > { %3546 = vmatpush3.bf16.msra.mxu1 %v3991_v29 }
 0x82f   : > { %3547 = vmatprep.subr.bf16.mxu1 %v3992_v31 }
 0x831   : > { %s5496_s16 = smov (!%p3448_p12), %s5495_s2 }
 0x832   : > { %3548 = vmatpush3.bf16.msra.mxu1 %v3993_v32  ;;  %v4047_v28 = vld [vmem:[%s5496_s16 + $0x8] sm:$0xff] (!%p3448_p12)   ;;  %v4049_v35 = vld [vmem:[%s5496_s16 + $0x18] sm:$0xff] (!%p3448_p12)   ;;  %v4050_v37 = vld [vmem:[%s5496_s16 + $0x20] sm:$0xff] (!%p3448_p12)  }
 0x833   : > { %3549 = vmatprep.subr.bf16.mxu1 %v3994_v33  ;;  %v4051_v38 = vld [vmem:[%s5496_s16 + $0x28] sm:$0xff] (!%p3448_p12)   ;;  %v4052_v39 = vld [vmem:[%s5496_s16 + $0x30] sm:$0xff] (!%p3448_p12)   ;;  %v4053_v5 = vld [vmem:[%s5496_s16 + $0x38] sm:$0xff] (!%p3448_p12)  }
 0x836   : > { %3550 = vmatpush3.bf16.msra.mxu1 %v3995_v34  ;;  %v4048_v34 = vld [vmem:[%s5496_s16 + $0x10] sm:$0xff] (!%p3448_p12)  }
 0x8b3   : > { %v2521_v42 = vpop.xlane.xlu0 %2520 }
 0x8b4   : > { %v2524_v43 = vmul.f32 0.0078125, %v2521_v42 }
 0x8b5   : > { %v2523_v44 = vpop.xlane.xlu1 %2522 }
 0x8b6   : > { %v2526_v45 = vsub.f32 %v5194_v36, %v2524_v43  ;;  %v2525_v46 = vmul.f32 0.0078125, %v2523_v44 }
 0x8b8   : > { %v2527_v6 = vsub.f32 %v5196_v40, %v2525_v46  ;;  %v2528_v10 = vmul.f32 %v2526_v45, %v2526_v45 }
 0x8ba   : > { %2530 = vadd.xlane.f32.xlu0 %v2528_v10  ;;  %v2529_v12 = vmul.f32 %v2527_v6, %v2527_v6 }
 0x8bc   : > { %2532 = vadd.xlane.f32.xlu1 %v2529_v12 }
 0x947   : > { %v2531_v0 = vpop.xlane.xlu0 %2530 }
 0x948   : > { %v2534_v1 = vmul.f32 0.0078125, %v2531_v0 }
 0x949   : > { %v2533_v2 = vpop.xlane.xlu1 %2532 }
 0x94a   : > { %v2536_v3 = vadd.f32 1e-05, %v2534_v1  ;;  %v2535_v4 = vmul.f32 0.0078125, %v2533_v2 }
 0x94c   : > { %4032 = vrsqrt.f32 %v2536_v3  ;;  %v2537_v7 = vadd.f32 1e-05, %v2535_v4 }
 0x94e   : > { %4034 = vrsqrt.f32 %v2537_v7 }
 0x956   : > { %v4033_v8 = vpop.eup %4032 }
 0x957   : > { %v2540_v14 = vmul.f32 %v4033_v8, %v2526_v45 }
 0x958   : > { %v4035_v15 = vpop.eup %4034 }
 0x959   : > { %v2541_v16 = vmul.f32 %v4035_v15, %v2527_v6  ;;  %v2548_v17 = vmul.f32 %v3413_v13, %v2540_v14  ;;  %v3447_v14 = vld [vmem:[%s969_s8] ss:$0 sm:$0xff] }
 0x95b   : > { %v2549_v30 = vmul.f32 %v3413_v13, %v2541_v16  ;;  %v2556_v19 = vadd.f32 %v3414_v18, %v2548_v17 }
 0x95d   : > { %v2557_v20 = vadd.f32 %v3414_v18, %v2549_v30 }
 0x95f   : > { %v2558_v21 = vpack.c.bf16 %v2557_v20, %v2556_v19 }
 0x961   : > { %2700 = vmatmul.mubr.bf16.vlgmr.msra.gmra.mrb[48].mxu0 %v2558_v21 }
 0xa34   : > { %v2701_v41 = vpop.f32.mrb[48].mxu0 }
 0xa35   : > { %v2702_v42 = vadd.f32 %v2701_v41, %v2580_v9  ;;  %v2703_v43 = vpop.f32.mrb[49].mxu0 }
 0xa36   : > { %v2704_v44 = vadd.f32 %v2703_v43, %v2584_v11  ;;  %v2705_v45 = vpop.f32.mrb[50].mxu0  ;;  %v2927_v43 = vld [vmem:[%s5497_s29] sm:$0x1] (!%p3448_p12) }
 0xa37   : > { %v2714_v46 = vmul.f32 0.70710677, %v2702_v42  ;;  %v2706_v6 = vadd.f32 %v2705_v45, %v2580_v9  ;;  %v2707_v10 = vpop.f32.mrb[51].mxu0  ;;  %v2710_v56 = vmul.f32 0.5, %v2702_v42  ;;  %v2928_v45 = vld [vmem:[%s5498_s11] sm:$0x1] (!%p3448_p12) }
 0xa38   : > { %v2715_v12 = vmul.f32 0.70710677, %v2704_v44  ;;  %v2708_v47 = vadd.f32 %v2707_v10, %v2584_v11  ;;  %v2711_v59 = vmul.f32 0.5, %v2704_v44 }
 0xa39   : > { %4036 = verf.f32 %v2714_v46  ;;  %v2716_v48 = vmul.f32 0.70710677, %v2706_v6  ;;  %v2712_v57 = vmul.f32 0.5, %v2706_v6 }
 0xa3a   : > { %4038 = verf.f32 %v2715_v12  ;;  %v2717_v49 = vmul.f32 0.70710677, %v2708_v47  ;;  %v2713_v60 = vmul.f32 0.5, %v2708_v47  ;;  %v2959_v12 = vld [vmem:[%s5499_s9] sm:$0x1] (!%p3448_p12) }
 0xa3b   : > { %4040 = verf.f32 %v2716_v48 }
 0xa3c   : > { %4042 = verf.f32 %v2717_v49 }
 0xa43   : > { %v4037_v50 = vpop.eup %4036 }
 0xa44   : > { %v4039_v51 = vpop.eup %4038  ;;  %v2722_v52 = vadd.f32 1.0, %v4037_v50 }
 0xa45   : > { %v4041_v53 = vpop.eup %4040  ;;  %v2723_v54 = vadd.f32 1.0, %v4039_v51 }
 0xa46   : > { %v4043_v55 = vpop.eup %4042  ;;  %v2724_v58 = vadd.f32 1.0, %v4041_v53  ;;  %v2726_v62 = vmul.f32 %v2722_v52, %v2710_v56 }
 0xa47   : > { %v2725_v61 = vadd.f32 1.0, %v4043_v55  ;;  %v2727_v0 = vmul.f32 %v2723_v54, %v2711_v59 }
 0xa48   : > { %v2728_v63 = vmul.f32 %v2724_v58, %v2712_v57 }
 0xa49   : > { %v2729_v1 = vmul.f32 %v2725_v61, %v2713_v60 }
 0xa4a   : > { %v2730_v2 = vpack.c.bf16 %v2728_v63, %v2726_v62 }
 0xa4b   : > { %v2731_v3 = vpack.c.bf16 %v2729_v1, %v2727_v0 }
 0xa4d   : > { %2892 = vmatprep.mubr.bf16.mxu1 %v2731_v3 }
 0xa4e   : > { %2893 = vmatmul.mubr.bf16.vlgmr.msra.gmra.mrb[48].mxu1 %v2730_v2 }
 0xb21   : > { %v3551_v4 = vpop.f32.mrb[48].mxu1 }
 0xb22   : > { %v3552_v7 = vpop.f32.mrb[49].mxu1 }
 0xb23   : > { %v3553_v8 = vadd.f32 %v3552_v7, %v3551_v4  ;;  %v3554_v13 = vpop.f32.mrb[50].mxu1 }
 0xb24   : > { %v3555_v15 = vpop.f32.mrb[51].mxu1 }
 0xb25   : > { %v2901_v16 = vadd.f32 %v3553_v8, %v5194_v36  ;;  %v3556_v17 = vadd.f32 %v3555_v15, %v3554_v13  ;;  %2917 = sbr.rel (%p3448_p12) target bundleno = 3403 (0xd4b), region = 136  ;;  %v4046_v36 = vld [vmem:[%s5495_s2] sm:$0xff] (!%p3448_p12)  }
 0xb27   : > { %v2910_v18 = vadd.f32 %v3447_v14, %v2901_v16  ;;  %v2902_v30 = vadd.f32 %v3556_v17, %v5196_v40  ;;  %v4416_v40 = vmov (!%p3448_p12), 0.0  }
 0xb28   : > { %3752 = vmatprep.subr.bf16.mxu0 (!%p3448_p12), %v4416_v40  ;;  %3768 = vmatprep.mubr.msk.bf16.mxu0 (!%p3448_p12), %vm4417_vm5, %v4416_v40 }
 0xb29   : > { %2912 = vst [vmem:[#allocation2] sm:$0xff] %v2910_v18  ;;  %v2911_v19 = vadd.f32 %v3447_v14, %v2902_v30  ;;  %3753 = vmatpush3.bf16.msra.mxu0 (!%p3448_p12), %v4046_v36 }
 0xb2a   : > { %3754 = vmatprep.subr.bf16.mxu0 (!%p3448_p12), %v4416_v40 }
 0xb2b   : > { %2913 = vst [vmem:[#allocation2 + $0x8] sm:$0xff] %v2911_v19  ;;  %v2918_v20 = vadd.f32 (!%p3448_p12), %v2911_v19, %v2910_v18 }
 0xb2d   : > { %v2919_v21 = vrot.slane %v2918_v20, 4  ;;  %3755 = vmatpush3.bf16.msra.mxu0 %v4047_v28 }
 0xb2e   : > { %3756 = vmatprep.subr.bf16.mxu0 %v4416_v40 }
 0xb2f   : > { %v2920_v22 = vadd.f32 %v2919_v21, %v2918_v20 }
 0xb31   : > { %v2921_v23 = vrot.slane %v2920_v22, 2  ;;  %3757 = vmatpush3.bf16.msra.mxu0 %v4048_v34 }
 0xb32   : > { %3758 = vmatprep.subr.bf16.mxu0 %v4416_v40 }
 0xb33   : > { %v2922_v24 = vadd.f32 %v2921_v23, %v2920_v22 }
 0xb35   : > { %v2923_v25 = vrot.slane %v2922_v24, 1  ;;  %3759 = vmatpush3.bf16.msra.mxu0 %v4049_v35 }
 0xb36   : > { %3760 = vmatprep.subr.bf16.mxu0 %v4416_v40 }
 0xb37   : > { %v2924_v26 = vadd.f32 %v2923_v25, %v2922_v24 }
 0xb39   : > { %v2926_v27 = vmul.f32 0.0625, %v2924_v26  ;;  %3761 = vmatpush3.bf16.msra.mxu0 %v4050_v37 }
 0xb3a   : > { %3762 = vmatprep.subr.bf16.mxu0 %v4416_v40 }
 0xb3b   : > { %2929 = vadd.xlane.f32.xlu0 %v2926_v27 }
 0xb3d   : > { %3763 = vmatpush3.bf16.msra.mxu0 %v4051_v38 }
 0xb3e   : > { %3764 = vmatprep.subr.bf16.mxu0 %v4416_v40 }
 0xb41   : > { %3765 = vmatpush3.bf16.msra.mxu0 %v4052_v39 }
 0xb42   : > { %3766 = vmatprep.subr.bf16.mxu0 %v4416_v40 }
 0xb45   : > { %3767 = vmatpush3.bf16.msra.mxu0 %v4053_v5 }
 0xbc8   : > { %v2930_v29 = vpop.xlane.xlu0 %2929 }
 0xbc9   : > { %v2931_v31 = vmul.f32 0.0078125, %v2930_v29 }
 0xbcb   : > { %v2932_v32 = vsub.f32 %v2926_v27, %v2931_v31 }
 0xbcd   : > { %v2933_v33 = vmul.f32 %v2932_v32, %v2932_v32 }
 0xbcf   : > { %2934 = vadd.xlane.f32.xlu0 %v2933_v33 }
 0xc5c   : > { %v2935_v9 = vpop.xlane.xlu0 %2934 }
 0xc5d   : > { %v2936_v11 = vmul.f32 0.0078125, %v2935_v9 }
 0xc5f   : > { %v2937_v41 = vadd.f32 1e-05, %v2936_v11 }
 0xc61   : > { %4054 = vrsqrt.f32 %v2937_v41 }
 0xc6b   : > { %v4055_v42 = vpop.eup %4054 }
 0xc6c   : > { %v2939_v44 = vmul.f32 %v4055_v42, %v2932_v32 }
 0xc6e   : > { %v2940_v46 = vmul.f32 %v2939_v44, %v2927_v43 }
 0xc70   : > { %v2941_v6 = vadd.f32 %v2940_v46, %v2928_v45 }
 0xc72   : > { %v2942_v10 = vpack.c.bf16 %v2941_v6, %v2941_v6 }
 0xc74   : > { %3769 = vmatmul.mubr.bf16.vlgmr.msra.gmra.mrb[0].mxu0 %v2942_v10 }
 0xd47   : > { %v3042_v47 = vpop.f32.mrb[0].mxu0 }
 0xd48   : > { %v3043_v48 = vadd.f32 %v3042_v47, %v2959_v12  ;;  %v3770_v49 = vpop.f32.mrb[1].mxu0 }
 0xd49   : > { %v3045_v50 = vpop.f32.mrb[2].mxu0 }
 0xd4a   : > { %3049 = vst.msk [vmem:[%s4982_s13] sm:$0x1] %vm3048_vm6, %v3043_v48  ;;  %v3771_v51 = vpop.f32.mrb[3].mxu0 }
 0xd4b PF: > { %s5500_s4 = sld [smem:[#allocation26_spill]]  ;;  %s5501_s8 = sld [smem:[#allocation33_spill]] }
 0xd4c   : > { %s5502_s18 = sld [smem:[#allocation57_spill]]  ;;  %s3063_s24 = sshll.u32 %s4982_s13, 4  ;;  %s3064_s24 = int_to_ptr.vmem [resolvable:$true] %s3063_s24 }
 0xd4d   : > { %s5503_s1 = sand.u32 1, %s4362_s22   ;;  %s4264_s0 = scalar_lea.vmem %s3064_s24, 16 }
 0xd4e   : > { %s3051_s3 = scalar_lea.sflag [#allocation5], %s5503_s1  ;;  %p4265_p3 = scmp.ne.s32.totalorder %s3064_s24, %s4264_s0 }
 0xd4f   : > { %s4418_s28 = smov [#allocation15]  }
 0xd50   : > { %s4268_s26 = sshll.u32 %s4418_s28, 4  ;;  %s4269_s26 = int_to_ptr.vmem [resolvable:$false] %s4268_s26 }
 0xd51   : > { %s3457_s2 = sshll.u32 %s5500_s4, 4  ;;  %p5504_p10 = scmp.ne.s32.totalorder %s5501_s8, 0 }
 0xd52   : > { %s5291_s6 = scalar_lea.hbm %s5502_s18, %s3457_s2  ;;  %s4270_s21 = scalar_lea.vmem %s4269_s26, 32 }
 0xd53   : > { %p4266_p1 = pnand %p4265_p3, %p5504_p10  ;;  %p4271_p4 = scmp.lt.s32.totalorder %s3064_s24, %s4269_s26 }
 0xd54   : > { %p4272_p0 = scmp.lt.s32.totalorder %s4270_s21, %s4264_s0 }
 0xd55   : > { %p4267_p2 = pneg %p4266_p1 }
 0xd56   : > { %p4273_p8 = por %p4272_p0, %p4271_p4 }
 0xd58   : > { %p4274_p13 = pnand %p4273_p8, %p4267_p2 }
 0xd5a   : > { %4277 = shalt.err (!%p4274_p13)
}
 0xd5b   : > { %s4278_s13 = scalar_lea.hbm %s5291_s6, 16  ;;  %s4282_s5 = scalar_lea.hbm %s5502_s18, 32 }
 0xd5c   : > { %p4279_p9 = scmp.ne.s32.totalorder %s5291_s6, %s4278_s13  ;;  %p4283_p7 = scmp.lt.u32.totalorder %s5291_s6, %s5502_s18 }
 0xd5d   : > { %p4284_p5 = scmp.lt.u32.totalorder %s4282_s5, %s4278_s13  ;;  %p4286_p3 = scmp.lt.u32.totalorder %s4278_s13, %s5291_s6 }
 0xd5e   : > { %p4280_p11 = pnand %p4279_p9, %p5504_p10 }
 0xd5f   : > { %p4285_p12 = por %p4284_p5, %p4283_p7 }
 0xd60   : > { %p4281_p6 = pneg %p4280_p11 }
 0xd61   : > { %p4287_p1 = por %p4286_p3, %p4285_p12 }
 0xd63   : > { %p4288_p2 = pnand %p4287_p1, %p4281_p6 }
 0xd65   : > { %4291 = shalt.err (!%p4288_p2)
}
 0xd66   : > { %3788 = dma.vmem_to_hbm [thread:$0]  (%p5504_p10), %s3064_s24, 16, %s5291_s6, %s3051_s3  }
 0xd67 PF: > { %s5505_s29 = sld [smem:[#allocation29_spill]]  ;;  %s5506_s19 = sld [smem:[#allocation21_spill]] }
 0xd68   : > { %s5507_s15 = sld [smem:[#allocation34_spill]] }
 0xd6d   : > { %p3820_p4 = scmp.ge.s32.totalorder %s5505_s29, 2  ;;  %s3075_s11 = sand.u32 1, %s5506_s19  }
 0xd6e   : > { %p5508_p0 = scmp.ne.s32.totalorder %s5507_s15, 0  ;;  %s3076_s23 = scalar_lea.sflag [#allocation5], %s3075_s11 }
 0xd70   : > { %p3814_p8 = pnand %p3820_p4, %p5508_p0 }
 0xd72   : > { %4353 = dma.done.wait (!%p3814_p8), %s3076_s23, 16  }
 0xd73   : > { %4355 = vsyncadd (!%p3814_p8), %s3076_s23, 4294967280  ;;  %s43_s4 = sadd.s32 1, %s5505_s29   ;;  %s5509_s7 = sld [smem:[#allocation22_spill]] }
 0xd74   : > { %p40_p13 = scmp.ge.s32.totalorder %s43_s4, 6   ;;  %s5510_s23 = sld [smem:[#allocation35_spill]] }
 0xd75   : > { %s5511_s24 = sld [smem:[#allocation23_spill]]  ;;  %s5512_s2 = sld [smem:[#allocation24_spill]] }
 0xd76   : > { %s5513_s25 = sld [smem:[#allocation31_spill]]  ;;  %s5514_s3 = sld [smem:[#allocation27_spill]] }
 0xd77   : > { %s5515_s26 = sld [smem:[#allocation28_spill]]  ;;  %s5516_s27 = sld [smem:[#allocation30_spill]] }
 0xd78   : > { %s5517_s28 = sld [smem:[#allocation32_spill]]  ;;  %s5518_s1 = smov %s4362_s22 }
 0xd79   : > { %s5519_s22 = smov %s5509_s7  ;;  %42 = sbr.rel (!%p40_p13) target bundleno = 36 (0x24), region = 238 }
 0xd80   :  { %3080 = vsyncpa [#allocation4], 1 }
 0xd81   :  { %3082 = vsyncpa [#allocation4 + $0x1], 1 }
 0xd82   :  { %3083 = vsyncpa [#allocation7], 1 }
 0xd83   :  { %3085 = vsyncpa [#allocation7 + $0x1], 1 }
 0xd84   :  { %3086 = vsyncpa [#allocation10], 1 }
 0xd85   :  { %3088 = vsyncpa [#allocation10 + $0x1], 1 }
 0xd86   :  { %3089 = vsyncpa [#allocation13], 1 }
 0xd87   :  { %3091 = vsyncpa [#allocation13 + $0x1], 1 }
 0xd88   :  { %3092 = vsyncpa [#allocation5], 1 }
 0xd89   :  { %3094 = vsyncpa [#allocation5 + $0x1], 1 }

</bundles_post_ra>
